<compile_context>
chip_gen: v7x
topology: tpu7x:2x2x1
jax: 0.10.0
libtpu: 0.0.40
codegen_flags: <defaults>
</compile_context>

<pallas_src>
import functools

import jax
import jax.numpy as jnp
from jax.experimental import pallas as pl
from jax.experimental.pallas import tpu as pltpu


def _spatial_attention_kernel(w_ref, x_ref, o_ref, *, TB, C, H, W, K,
                              mul_in_f32):
    """One batch tile per grid step.

    w_ref: (2*K*K,) f32 SMEM (scalar-prefetched conv weight, [1,2,K,K] flat)
    x_ref: (TB, C, H*W)  VMEM, lane-dense
    o_ref: (TB, C, H*W)  VMEM, lane-dense
    """
    P = K // 2
    HW = H * W
    LP = (H + 2 * P) * W                                # padded flat-map length

    x = x_ref[...]                                      # (TB, C, HW)

    # Channel reductions on the lane-dense layout (f32 accumulation, no full
    # f32 copy of x is materialized).
    avg = jnp.mean(x, axis=1, dtype=jnp.float32)        # (TB, HW)
    mx = jnp.max(x, axis=1).astype(jnp.float32)         # (TB, HW)

    # Pad P rows (P*W lanes) of zeros on both ends of each flattened map.
    zrows = jnp.zeros((TB, P * W), jnp.float32)
    padded = (jnp.concatenate([zrows, avg, zrows], axis=1),
              jnp.concatenate([zrows, mx, zrows], axis=1))   # each (TB, LP)

    # Column (within each image row) of every flattened position — used to
    # zero the horizontal (kw) taps at the left/right image borders.
    col = jax.lax.broadcasted_iota(jnp.int32, (1, LP), 1) % W

    def shifted_masked(a, dw):
        # S[p] = a[p + dw] if column (p % W) + dw stays inside [0, W), else 0.
        if dw == 0:
            return a
        zfill = jnp.zeros((TB, abs(dw)), jnp.float32)
        if dw > 0:
            s = jnp.concatenate([a[:, dw:], zfill], axis=1)
            return jnp.where(col < W - dw, s, 0.0)
        s = jnp.concatenate([zfill, a[:, :dw]], axis=1)
        return jnp.where(col >= -dw, s, 0.0)

    # KxK conv, 2 in-channels -> 1 out-channel, fully lane-dense:
    #   out[q] = sum_{c,kh,kw} w[c,kh,kw] * S_{c,kw}[q + kh*W]
    #          = sum_kh acc_kh[q + kh*W],  acc_kh = sum_{c,kw} w[c,kh,kw]*S_{c,kw}
    # so the 2*K*K tap loop is pure VALU; only the 2*K shifted copies and the
    # K final offset slices touch the XLU.
    accs = [None] * K
    for c in range(2):
        for kw in range(K):
            s = shifted_masked(padded[c], kw - P)        # (TB, LP)
            for kh in range(K):
                wv = w_ref[c * K * K + kh * K + kw]      # scalar from SMEM
                term = wv * s
                accs[kh] = term if accs[kh] is None else accs[kh] + term

    logits = accs[0][:, 0:HW]
    for kh in range(1, K):
        logits = logits + accs[kh][:, kh * W:kh * W + HW]

    att = jax.nn.sigmoid(logits)                         # (TB, HW), f32

    if mul_in_f32:
        out = x.astype(jnp.float32) * att[:, None, :]
    else:
        out = x * att[:, None, :].astype(x.dtype)
    o_ref[...] = out.astype(o_ref.dtype)                 # full, unmasked stores


def _tpu_config():
    """Returns (physical VMEM bytes, #TensorCores to feed, target block bytes)."""
    vmem_cap = 128 << 20
    try:
        vmem_cap = int(getattr(pltpu.get_tpu_info(), "vmem_capacity_bytes",
                               vmem_cap))
    except Exception:
        pass
    if vmem_cap <= (80 << 20):
        # v7x-like: 64 MiB VMEM per TensorCore, 2 TensorCores per chip.
        return vmem_cap, 2, 5 << 20
    # v5e / v6e: 128 MiB VMEM, a single TensorCore -> fewer, bigger grid steps.
    return vmem_cap, 1, 12 << 20


def _choose_batch_tile(B, C, HW, LP, K, itemsize, vmem_cap, n_tc,
                       target_block_bytes):
    """Pick the batch-tile size and estimate per-step VMEM usage."""
    per_img_io = C * HW * itemsize                 # one input or output image
    # f32 in-kernel temporaries per batch row: pooled/attention maps (3*HW)
    # plus padded maps, one live shifted copy and K accumulators ((K+3)*LP),
    # with 1.5x headroom for compiler temporaries.
    per_img_tmp = int(1.5 * 4 * (3 * HW + (K + 3) * LP))
    # Input and output blocks are double-buffered by the pipeline.
    per_img_total = 4 * per_img_io + per_img_tmp

    budget = int(0.70 * vmem_cap)
    tb = max(1, min(B,
                    target_block_bytes // max(per_img_io, 1),
                    budget // max(per_img_total, 1)))
    if n_tc > 1 and B >= n_tc:
        # Keep >= n_tc grid steps so every TensorCore gets work (v7x only);
        # single-TC chips get one big block instead.
        tb = min(tb, pl.cdiv(B, n_tc))
    return int(tb), per_img_total


def spatial_attention(x, w, kernel_size=7):
    """x: (B, C, H, W); w: (1, 2, K, K) conv weight (no bias)."""
    B, C, H, W = x.shape
    K = kernel_size
    assert w.shape == (1, 2, K, K)
    P = K // 2
    HW = H * W
    LP = (H + 2 * P) * W

    x2 = x.reshape(B, C, HW)                       # lane-dense dominant stream
    w_flat = w.reshape(-1).astype(jnp.float32)     # (2*K*K,) -> SMEM prefetch

    vmem_cap, n_tc, target = _tpu_config()
    itemsize = jnp.dtype(x.dtype).itemsize
    TB, per_img_total = _choose_batch_tile(B, C, HW, LP, K, itemsize,
                                           vmem_cap, n_tc, target)

    grid_b = pl.cdiv(B, TB)
    B_pad = grid_b * TB
    if B_pad != B:
        # Awkward batch sizes: pad the batch instead of shrinking the tile.
        x2 = jnp.pad(x2, ((0, B_pad - B), (0, 0), (0, 0)))

    dev_kind = ""
    try:
        dev_kind = jax.devices()[0].device_kind.lower()
    except Exception:
        pass
    mul_in_f32 = (x.dtype == jnp.float32) or ("v5" in dev_kind)

    vmem_limit = int(min(int(0.75 * vmem_cap),
                         max(16 << 20, TB * per_img_total + (2 << 20))))

    kernel = functools.partial(_spatial_attention_kernel,
                               TB=TB, C=C, H=H, W=W, K=K,
                               mul_in_f32=mul_in_f32)

    out = pl.pallas_call(
        kernel,
        out_shape=jax.ShapeDtypeStruct((B_pad, C, HW), x.dtype),
        grid_spec=pltpu.PrefetchScalarGridSpec(
            num_scalar_prefetch=1,
            grid=(grid_b,),
            in_specs=[pl.BlockSpec((TB, C, HW), lambda b, w_s: (b, 0, 0))],
            out_specs=pl.BlockSpec((TB, C, HW), lambda b, w_s: (b, 0, 0)),
        ),
        compiler_params=pltpu.CompilerParams(
            dimension_semantics=("parallel",),
            vmem_limit_bytes=vmem_limit,
        ),
    )(w_flat, x2)

    if B_pad != B:
        out = out[:B]
    return out.reshape(B, C, H, W)


def spatial_attention_ref(x, w):
    """Pure-JAX reference matching the PyTorch forward."""
    avg = jnp.mean(x, axis=1, keepdims=True)
    mx = jnp.max(x, axis=1, keepdims=True)
    cat = jnp.concatenate([avg, mx], axis=1)
    att = jax.lax.conv_general_dilated(
        cat, w, window_strides=(1, 1), padding="SAME",
        dimension_numbers=("NCHW", "OIHW", "NCHW"),
        precision=jax.lax.Precision.HIGHEST)
    return x * jax.nn.sigmoid(att)


if __name__ == "__main__":
    B, C, H, W = 2, 4, 16, 16
    K = 7

    key = jax.random.PRNGKey(0)
    kx, kw = jax.random.split(key)

    x = jax.random.normal(kx, (B, C, H, W), dtype=jnp.float32)

    # Deterministic kaiming_normal_(mode='fan_in', nonlinearity='relu'):
    # std = sqrt(2 / fan_in), fan_in = in_channels * K * K = 2 * 7 * 7.
    fan_in = 2 * K * K
    std = (2.0 / fan_in) ** 0.5
    w = jax.random.normal(kw, (1, 2, K, K), dtype=jnp.float32) * std

    out = jax.block_until_ready(spatial_attention(x, w, kernel_size=K))
    ref = jax.block_until_ready(spatial_attention_ref(x, w))

    assert out.shape == (B, C, H, W)
    assert jnp.allclose(out, ref, atol=1e-4, rtol=1e-4), (
        f"max abs err = {jnp.max(jnp.abs(out - ref))}")

    print("KERNEL_OK")
</pallas_src>

<mosaic_0001>
module attributes {stable_mosaic.version = 11 : i64} {
  func.func @_spatial_attention_kernel(%arg0: i32, %arg1: memref<98xf32, #tpu.memory_space<smem>>, %arg2: memref<2x4x256xf32, #tpu.memory_space<vmem>>, %arg3: memref<2x4x256xf32, #tpu.memory_space<vmem>>) attributes {dimension_semantics = [#tpu.dimension_semantics<parallel>], iteration_bounds = array<i64: 1>, scalar_prefetch = 1 : i64, scratch_operands = 0 : i64, tpu.core_type = #tpu.core_type<tc>, window_params = [{transform_indices = @transform_0, window_bounds = array<i64: 2, 4, 256>}, {transform_indices = @transform_1, window_bounds = array<i64: 2, 4, 256>}]} {
    %c0 = arith.constant 0 : index
    %c0_0 = arith.constant 0 : index
    %c0_1 = arith.constant 0 : index
    %0 = vector.load %arg2[%c0, %c0_0, %c0_1] : memref<2x4x256xf32, #tpu.memory_space<vmem>>, vector<2x4x256xf32>
    %cst = arith.constant dense<0.000000e+00> : vector<2x256xf32>
    %1 = vector.multi_reduction <add>, %0, %cst [1] : vector<2x4x256xf32> to vector<2x256xf32>
    %cst_2 = arith.constant 4.000000e+00 : f32
    %2 = vector.broadcast %cst_2 : f32 to vector<2x256xf32>
    %3 = arith.divf %1, %2 : vector<2x256xf32>
    %cst_3 = arith.constant dense<0xFF800000> : vector<2x256xf32>
    %4 = vector.multi_reduction <maximumf>, %0, %cst_3 [1] : vector<2x4x256xf32> to vector<2x256xf32>
    %cst_4 = arith.constant 0.000000e+00 : f32
    %5 = vector.broadcast %cst_4 : f32 to vector<2x48xf32>
    %6 = tpu.concatenate %5, %3, %5 in 1 : vector<2x48xf32>, vector<2x256xf32>, vector<2x48xf32> -> vector<2x352xf32>
    %7 = tpu.concatenate %5, %4, %5 in 1 : vector<2x48xf32>, vector<2x256xf32>, vector<2x48xf32> -> vector<2x352xf32>
    %8 = tpu.iota {dimensions = array<i32: 1>} : vector<1x352xi32>
    %c16_i32 = arith.constant 16 : i32
    %c0_i32 = arith.constant 0 : i32
    %9 = arith.cmpi eq, %c16_i32, %c0_i32 : i32
    %c1_i32 = arith.constant 1 : i32
    %10 = arith.select %9, %c1_i32, %c16_i32 : i32
    %11 = vector.broadcast %10 : i32 to vector<1x352xi32>
    %12 = arith.remsi %8, %11 : vector<1x352xi32>
    %c0_i32_5 = arith.constant 0 : i32
    %13 = vector.broadcast %c0_i32_5 : i32 to vector<1x352xi32>
    %14 = arith.cmpi ne, %12, %13 : vector<1x352xi32>
    %c0_i32_6 = arith.constant 0 : i32
    %15 = vector.broadcast %c0_i32_6 : i32 to vector<1x352xi32>
    %16 = arith.cmpi slt, %12, %15 : vector<1x352xi32>
    %c0_i32_7 = arith.constant 0 : i32
    %17 = arith.cmpi slt, %10, %c0_i32_7 : i32
    %18 = vector.broadcast %17 : i1 to vector<1x352xi1>
    %19 = vector.broadcast %18 : vector<1x352xi1> to vector<1x352xi1>
    %20 = arith.xori %16, %19 : vector<1x352xi1>
    %21 = arith.andi %20, %14 : vector<1x352xi1>
    %22 = vector.broadcast %10 : i32 to vector<1x352xi32>
    %23 = arith.addi %12, %22 : vector<1x352xi32>
    %24 = arith.select %21, %23, %12 : vector<1x352xi1>, vector<1x352xi32>
    %cst_8 = arith.constant 0.000000e+00 : f32
    %25 = vector.broadcast %cst_8 : f32 to vector<2x3xf32>
    %26 = vector.extract_strided_slice %6 {offsets = [0, 0], sizes = [2, 349], strides = [1, 1]} : vector<2x352xf32> to vector<2x349xf32>
    %27 = tpu.concatenate %25, %26 in 1 : vector<2x3xf32>, vector<2x349xf32> -> vector<2x352xf32>
    %c3_i32 = arith.constant 3 : i32
    %28 = vector.broadcast %c3_i32 : i32 to vector<1x352xi32>
    %29 = arith.cmpi sge, %24, %28 : vector<1x352xi32>
    %cst_9 = arith.constant 0.000000e+00 : f32
    %30 = vector.shape_cast %29 : vector<1x352xi1> to vector<1x352xi1>
    %31 = vector.broadcast %30 : vector<1x352xi1> to vector<2x352xi1>
    %32 = vector.broadcast %cst_9 : f32 to vector<2x352xf32>
    %33 = arith.select %31, %27, %32 : vector<2x352xi1>, vector<2x352xf32>
    %c0_10 = arith.constant 0 : index
    %34 = memref.load %arg1[%c0_10] : memref<98xf32, #tpu.memory_space<smem>>
    %35 = vector.broadcast %34 : f32 to vector<2x352xf32>
    %36 = arith.mulf %35, %33 : vector<2x352xf32>
    %c7 = arith.constant 7 : index
    %37 = memref.load %arg1[%c7] : memref<98xf32, #tpu.memory_space<smem>>
    %38 = vector.broadcast %37 : f32 to vector<2x352xf32>
    %39 = arith.mulf %38, %33 : vector<2x352xf32>
    %c14 = arith.constant 14 : index
    %40 = memref.load %arg1[%c14] : memref<98xf32, #tpu.memory_space<smem>>
    %41 = vector.broadcast %40 : f32 to vector<2x352xf32>
    %42 = arith.mulf %41, %33 : vector<2x352xf32>
    %c21 = arith.constant 21 : index
    %43 = memref.load %arg1[%c21] : memref<98xf32, #tpu.memory_space<smem>>
    %44 = vector.broadcast %43 : f32 to vector<2x352xf32>
    %45 = arith.mulf %44, %33 : vector<2x352xf32>
    %c28 = arith.constant 28 : index
    %46 = memref.load %arg1[%c28] : memref<98xf32, #tpu.memory_space<smem>>
    %47 = vector.broadcast %46 : f32 to vector<2x352xf32>
    %48 = arith.mulf %47, %33 : vector<2x352xf32>
    %c35 = arith.constant 35 : index
    %49 = memref.load %arg1[%c35] : memref<98xf32, #tpu.memory_space<smem>>
    %50 = vector.broadcast %49 : f32 to vector<2x352xf32>
    %51 = arith.mulf %50, %33 : vector<2x352xf32>
    %c42 = arith.constant 42 : index
    %52 = memref.load %arg1[%c42] : memref<98xf32, #tpu.memory_space<smem>>
    %53 = vector.broadcast %52 : f32 to vector<2x352xf32>
    %54 = arith.mulf %53, %33 : vector<2x352xf32>
    %cst_11 = arith.constant 0.000000e+00 : f32
    %55 = vector.broadcast %cst_11 : f32 to vector<2x2xf32>
    %56 = vector.extract_strided_slice %6 {offsets = [0, 0], sizes = [2, 350], strides = [1, 1]} : vector<2x352xf32> to vector<2x350xf32>
    %57 = tpu.concatenate %55, %56 in 1 : vector<2x2xf32>, vector<2x350xf32> -> vector<2x352xf32>
    %c2_i32 = arith.constant 2 : i32
    %58 = vector.broadcast %c2_i32 : i32 to vector<1x352xi32>
    %59 = arith.cmpi sge, %24, %58 : vector<1x352xi32>
    %cst_12 = arith.constant 0.000000e+00 : f32
    %60 = vector.shape_cast %59 : vector<1x352xi1> to vector<1x352xi1>
    %61 = vector.broadcast %60 : vector<1x352xi1> to vector<2x352xi1>
    %62 = vector.broadcast %cst_12 : f32 to vector<2x352xf32>
    %63 = arith.select %61, %57, %62 : vector<2x352xi1>, vector<2x352xf32>
    %c1 = arith.constant 1 : index
    %64 = memref.load %arg1[%c1] : memref<98xf32, #tpu.memory_space<smem>>
    %65 = vector.broadcast %64 : f32 to vector<2x352xf32>
    %66 = arith.mulf %65, %63 : vector<2x352xf32>
    %67 = arith.addf %36, %66 : vector<2x352xf32>
    %c8 = arith.constant 8 : index
    %68 = memref.load %arg1[%c8] : memref<98xf32, #tpu.memory_space<smem>>
    %69 = vector.broadcast %68 : f32 to vector<2x352xf32>
    %70 = arith.mulf %69, %63 : vector<2x352xf32>
    %71 = arith.addf %39, %70 : vector<2x352xf32>
    %c15 = arith.constant 15 : index
    %72 = memref.load %arg1[%c15] : memref<98xf32, #tpu.memory_space<smem>>
    %73 = vector.broadcast %72 : f32 to vector<2x352xf32>
    %74 = arith.mulf %73, %63 : vector<2x352xf32>
    %75 = arith.addf %42, %74 : vector<2x352xf32>
    %c22 = arith.constant 22 : index
    %76 = memref.load %arg1[%c22] : memref<98xf32, #tpu.memory_space<smem>>
    %77 = vector.broadcast %76 : f32 to vector<2x352xf32>
    %78 = arith.mulf %77, %63 : vector<2x352xf32>
    %79 = arith.addf %45, %78 : vector<2x352xf32>
    %c29 = arith.constant 29 : index
    %80 = memref.load %arg1[%c29] : memref<98xf32, #tpu.memory_space<smem>>
    %81 = vector.broadcast %80 : f32 to vector<2x352xf32>
    %82 = arith.mulf %81, %63 : vector<2x352xf32>
    %83 = arith.addf %48, %82 : vector<2x352xf32>
    %c36 = arith.constant 36 : index
    %84 = memref.load %arg1[%c36] : memref<98xf32, #tpu.memory_space<smem>>
    %85 = vector.broadcast %84 : f32 to vector<2x352xf32>
    %86 = arith.mulf %85, %63 : vector<2x352xf32>
    %87 = arith.addf %51, %86 : vector<2x352xf32>
    %c43 = arith.constant 43 : index
    %88 = memref.load %arg1[%c43] : memref<98xf32, #tpu.memory_space<smem>>
    %89 = vector.broadcast %88 : f32 to vector<2x352xf32>
    %90 = arith.mulf %89, %63 : vector<2x352xf32>
    %91 = arith.addf %54, %90 : vector<2x352xf32>
    %cst_13 = arith.constant 0.000000e+00 : f32
    %92 = vector.broadcast %cst_13 : f32 to vector<2x1xf32>
    %93 = vector.extract_strided_slice %6 {offsets = [0, 0], sizes = [2, 351], strides = [1, 1]} : vector<2x352xf32> to vector<2x351xf32>
    %94 = tpu.concatenate %92, %93 in 1 : vector<2x1xf32>, vector<2x351xf32> -> vector<2x352xf32>
    %c1_i32_14 = arith.constant 1 : i32
    %95 = vector.broadcast %c1_i32_14 : i32 to vector<1x352xi32>
    %96 = arith.cmpi sge, %24, %95 : vector<1x352xi32>
    %cst_15 = arith.constant 0.000000e+00 : f32
    %97 = vector.shape_cast %96 : vector<1x352xi1> to vector<1x352xi1>
    %98 = vector.broadcast %97 : vector<1x352xi1> to vector<2x352xi1>
    %99 = vector.broadcast %cst_15 : f32 to vector<2x352xf32>
    %100 = arith.select %98, %94, %99 : vector<2x352xi1>, vector<2x352xf32>
    %c2 = arith.constant 2 : index
    %101 = memref.load %arg1[%c2] : memref<98xf32, #tpu.memory_space<smem>>
    %102 = vector.broadcast %101 : f32 to vector<2x352xf32>
    %103 = arith.mulf %102, %100 : vector<2x352xf32>
    %104 = arith.addf %67, %103 : vector<2x352xf32>
    %c9 = arith.constant 9 : index
    %105 = memref.load %arg1[%c9] : memref<98xf32, #tpu.memory_space<smem>>
    %106 = vector.broadcast %105 : f32 to vector<2x352xf32>
    %107 = arith.mulf %106, %100 : vector<2x352xf32>
    %108 = arith.addf %71, %107 : vector<2x352xf32>
    %c16 = arith.constant 16 : index
    %109 = memref.load %arg1[%c16] : memref<98xf32, #tpu.memory_space<smem>>
    %110 = vector.broadcast %109 : f32 to vector<2x352xf32>
    %111 = arith.mulf %110, %100 : vector<2x352xf32>
    %112 = arith.addf %75, %111 : vector<2x352xf32>
    %c23 = arith.constant 23 : index
    %113 = memref.load %arg1[%c23] : memref<98xf32, #tpu.memory_space<smem>>
    %114 = vector.broadcast %113 : f32 to vector<2x352xf32>
    %115 = arith.mulf %114, %100 : vector<2x352xf32>
    %116 = arith.addf %79, %115 : vector<2x352xf32>
    %c30 = arith.constant 30 : index
    %117 = memref.load %arg1[%c30] : memref<98xf32, #tpu.memory_space<smem>>
    %118 = vector.broadcast %117 : f32 to vector<2x352xf32>
    %119 = arith.mulf %118, %100 : vector<2x352xf32>
    %120 = arith.addf %83, %119 : vector<2x352xf32>
    %c37 = arith.constant 37 : index
    %121 = memref.load %arg1[%c37] : memref<98xf32, #tpu.memory_space<smem>>
    %122 = vector.broadcast %121 : f32 to vector<2x352xf32>
    %123 = arith.mulf %122, %100 : vector<2x352xf32>
    %124 = arith.addf %87, %123 : vector<2x352xf32>
    %c44 = arith.constant 44 : index
    %125 = memref.load %arg1[%c44] : memref<98xf32, #tpu.memory_space<smem>>
    %126 = vector.broadcast %125 : f32 to vector<2x352xf32>
    %127 = arith.mulf %126, %100 : vector<2x352xf32>
    %128 = arith.addf %91, %127 : vector<2x352xf32>
    %c3 = arith.constant 3 : index
    %129 = memref.load %arg1[%c3] : memref<98xf32, #tpu.memory_space<smem>>
    %130 = vector.broadcast %129 : f32 to vector<2x352xf32>
    %131 = arith.mulf %130, %6 : vector<2x352xf32>
    %132 = arith.addf %104, %131 : vector<2x352xf32>
    %c10 = arith.constant 10 : index
    %133 = memref.load %arg1[%c10] : memref<98xf32, #tpu.memory_space<smem>>
    %134 = vector.broadcast %133 : f32 to vector<2x352xf32>
    %135 = arith.mulf %134, %6 : vector<2x352xf32>
    %136 = arith.addf %108, %135 : vector<2x352xf32>
    %c17 = arith.constant 17 : index
    %137 = memref.load %arg1[%c17] : memref<98xf32, #tpu.memory_space<smem>>
    %138 = vector.broadcast %137 : f32 to vector<2x352xf32>
    %139 = arith.mulf %138, %6 : vector<2x352xf32>
    %140 = arith.addf %112, %139 : vector<2x352xf32>
    %c24 = arith.constant 24 : index
    %141 = memref.load %arg1[%c24] : memref<98xf32, #tpu.memory_space<smem>>
    %142 = vector.broadcast %141 : f32 to vector<2x352xf32>
    %143 = arith.mulf %142, %6 : vector<2x352xf32>
    %144 = arith.addf %116, %143 : vector<2x352xf32>
    %c31 = arith.constant 31 : index
    %145 = memref.load %arg1[%c31] : memref<98xf32, #tpu.memory_space<smem>>
    %146 = vector.broadcast %145 : f32 to vector<2x352xf32>
    %147 = arith.mulf %146, %6 : vector<2x352xf32>
    %148 = arith.addf %120, %147 : vector<2x352xf32>
    %c38 = arith.constant 38 : index
    %149 = memref.load %arg1[%c38] : memref<98xf32, #tpu.memory_space<smem>>
    %150 = vector.broadcast %149 : f32 to vector<2x352xf32>
    %151 = arith.mulf %150, %6 : vector<2x352xf32>
    %152 = arith.addf %124, %151 : vector<2x352xf32>
    %c45 = arith.constant 45 : index
    %153 = memref.load %arg1[%c45] : memref<98xf32, #tpu.memory_space<smem>>
    %154 = vector.broadcast %153 : f32 to vector<2x352xf32>
    %155 = arith.mulf %154, %6 : vector<2x352xf32>
    %156 = arith.addf %128, %155 : vector<2x352xf32>
    %cst_16 = arith.constant 0.000000e+00 : f32
    %157 = vector.broadcast %cst_16 : f32 to vector<2x1xf32>
    %158 = vector.extract_strided_slice %6 {offsets = [0, 1], sizes = [2, 351], strides = [1, 1]} : vector<2x352xf32> to vector<2x351xf32>
    %159 = tpu.concatenate %158, %157 in 1 : vector<2x351xf32>, vector<2x1xf32> -> vector<2x352xf32>
    %c15_i32 = arith.constant 15 : i32
    %160 = vector.broadcast %c15_i32 : i32 to vector<1x352xi32>
    %161 = arith.cmpi slt, %24, %160 : vector<1x352xi32>
    %cst_17 = arith.constant 0.000000e+00 : f32
    %162 = vector.shape_cast %161 : vector<1x352xi1> to vector<1x352xi1>
    %163 = vector.broadcast %162 : vector<1x352xi1> to vector<2x352xi1>
    %164 = vector.broadcast %cst_17 : f32 to vector<2x352xf32>
    %165 = arith.select %163, %159, %164 : vector<2x352xi1>, vector<2x352xf32>
    %c4 = arith.constant 4 : index
    %166 = memref.load %arg1[%c4] : memref<98xf32, #tpu.memory_space<smem>>
    %167 = vector.broadcast %166 : f32 to vector<2x352xf32>
    %168 = arith.mulf %167, %165 : vector<2x352xf32>
    %169 = arith.addf %132, %168 : vector<2x352xf32>
    %c11 = arith.constant 11 : index
    %170 = memref.load %arg1[%c11] : memref<98xf32, #tpu.memory_space<smem>>
    %171 = vector.broadcast %170 : f32 to vector<2x352xf32>
    %172 = arith.mulf %171, %165 : vector<2x352xf32>
    %173 = arith.addf %136, %172 : vector<2x352xf32>
    %c18 = arith.constant 18 : index
    %174 = memref.load %arg1[%c18] : memref<98xf32, #tpu.memory_space<smem>>
    %175 = vector.broadcast %174 : f32 to vector<2x352xf32>
    %176 = arith.mulf %175, %165 : vector<2x352xf32>
    %177 = arith.addf %140, %176 : vector<2x352xf32>
    %c25 = arith.constant 25 : index
    %178 = memref.load %arg1[%c25] : memref<98xf32, #tpu.memory_space<smem>>
    %179 = vector.broadcast %178 : f32 to vector<2x352xf32>
    %180 = arith.mulf %179, %165 : vector<2x352xf32>
    %181 = arith.addf %144, %180 : vector<2x352xf32>
    %c32 = arith.constant 32 : index
    %182 = memref.load %arg1[%c32] : memref<98xf32, #tpu.memory_space<smem>>
    %183 = vector.broadcast %182 : f32 to vector<2x352xf32>
    %184 = arith.mulf %183, %165 : vector<2x352xf32>
    %185 = arith.addf %148, %184 : vector<2x352xf32>
    %c39 = arith.constant 39 : index
    %186 = memref.load %arg1[%c39] : memref<98xf32, #tpu.memory_space<smem>>
    %187 = vector.broadcast %186 : f32 to vector<2x352xf32>
    %188 = arith.mulf %187, %165 : vector<2x352xf32>
    %189 = arith.addf %152, %188 : vector<2x352xf32>
    %c46 = arith.constant 46 : index
    %190 = memref.load %arg1[%c46] : memref<98xf32, #tpu.memory_space<smem>>
    %191 = vector.broadcast %190 : f32 to vector<2x352xf32>
    %192 = arith.mulf %191, %165 : vector<2x352xf32>
    %193 = arith.addf %156, %192 : vector<2x352xf32>
    %cst_18 = arith.constant 0.000000e+00 : f32
    %194 = vector.broadcast %cst_18 : f32 to vector<2x2xf32>
    %195 = vector.extract_strided_slice %6 {offsets = [0, 2], sizes = [2, 350], strides = [1, 1]} : vector<2x352xf32> to vector<2x350xf32>
    %196 = tpu.concatenate %195, %194 in 1 : vector<2x350xf32>, vector<2x2xf32> -> vector<2x352xf32>
    %c14_i32 = arith.constant 14 : i32
    %197 = vector.broadcast %c14_i32 : i32 to vector<1x352xi32>
    %198 = arith.cmpi slt, %24, %197 : vector<1x352xi32>
    %cst_19 = arith.constant 0.000000e+00 : f32
    %199 = vector.shape_cast %198 : vector<1x352xi1> to vector<1x352xi1>
    %200 = vector.broadcast %199 : vector<1x352xi1> to vector<2x352xi1>
    %201 = vector.broadcast %cst_19 : f32 to vector<2x352xf32>
    %202 = arith.select %200, %196, %201 : vector<2x352xi1>, vector<2x352xf32>
    %c5 = arith.constant 5 : index
    %203 = memref.load %arg1[%c5] : memref<98xf32, #tpu.memory_space<smem>>
    %204 = vector.broadcast %203 : f32 to vector<2x352xf32>
    %205 = arith.mulf %204, %202 : vector<2x352xf32>
    %206 = arith.addf %169, %205 : vector<2x352xf32>
    %c12 = arith.constant 12 : index
    %207 = memref.load %arg1[%c12] : memref<98xf32, #tpu.memory_space<smem>>
    %208 = vector.broadcast %207 : f32 to vector<2x352xf32>
    %209 = arith.mulf %208, %202 : vector<2x352xf32>
    %210 = arith.addf %173, %209 : vector<2x352xf32>
    %c19 = arith.constant 19 : index
    %211 = memref.load %arg1[%c19] : memref<98xf32, #tpu.memory_space<smem>>
    %212 = vector.broadcast %211 : f32 to vector<2x352xf32>
    %213 = arith.mulf %212, %202 : vector<2x352xf32>
    %214 = arith.addf %177, %213 : vector<2x352xf32>
    %c26 = arith.constant 26 : index
    %215 = memref.load %arg1[%c26] : memref<98xf32, #tpu.memory_space<smem>>
    %216 = vector.broadcast %215 : f32 to vector<2x352xf32>
    %217 = arith.mulf %216, %202 : vector<2x352xf32>
    %218 = arith.addf %181, %217 : vector<2x352xf32>
    %c33 = arith.constant 33 : index
    %219 = memref.load %arg1[%c33] : memref<98xf32, #tpu.memory_space<smem>>
    %220 = vector.broadcast %219 : f32 to vector<2x352xf32>
    %221 = arith.mulf %220, %202 : vector<2x352xf32>
    %222 = arith.addf %185, %221 : vector<2x352xf32>
    %c40 = arith.constant 40 : index
    %223 = memref.load %arg1[%c40] : memref<98xf32, #tpu.memory_space<smem>>
    %224 = vector.broadcast %223 : f32 to vector<2x352xf32>
    %225 = arith.mulf %224, %202 : vector<2x352xf32>
    %226 = arith.addf %189, %225 : vector<2x352xf32>
    %c47 = arith.constant 47 : index
    %227 = memref.load %arg1[%c47] : memref<98xf32, #tpu.memory_space<smem>>
    %228 = vector.broadcast %227 : f32 to vector<2x352xf32>
    %229 = arith.mulf %228, %202 : vector<2x352xf32>
    %230 = arith.addf %193, %229 : vector<2x352xf32>
    %cst_20 = arith.constant 0.000000e+00 : f32
    %231 = vector.broadcast %cst_20 : f32 to vector<2x3xf32>
    %232 = vector.extract_strided_slice %6 {offsets = [0, 3], sizes = [2, 349], strides = [1, 1]} : vector<2x352xf32> to vector<2x349xf32>
    %233 = tpu.concatenate %232, %231 in 1 : vector<2x349xf32>, vector<2x3xf32> -> vector<2x352xf32>
    %c13_i32 = arith.constant 13 : i32
    %234 = vector.broadcast %c13_i32 : i32 to vector<1x352xi32>
    %235 = arith.cmpi slt, %24, %234 : vector<1x352xi32>
    %cst_21 = arith.constant 0.000000e+00 : f32
    %236 = vector.shape_cast %235 : vector<1x352xi1> to vector<1x352xi1>
    %237 = vector.broadcast %236 : vector<1x352xi1> to vector<2x352xi1>
    %238 = vector.broadcast %cst_21 : f32 to vector<2x352xf32>
    %239 = arith.select %237, %233, %238 : vector<2x352xi1>, vector<2x352xf32>
    %c6 = arith.constant 6 : index
    %240 = memref.load %arg1[%c6] : memref<98xf32, #tpu.memory_space<smem>>
    %241 = vector.broadcast %240 : f32 to vector<2x352xf32>
    %242 = arith.mulf %241, %239 : vector<2x352xf32>
    %243 = arith.addf %206, %242 : vector<2x352xf32>
    %c13 = arith.constant 13 : index
    %244 = memref.load %arg1[%c13] : memref<98xf32, #tpu.memory_space<smem>>
    %245 = vector.broadcast %244 : f32 to vector<2x352xf32>
    %246 = arith.mulf %245, %239 : vector<2x352xf32>
    %247 = arith.addf %210, %246 : vector<2x352xf32>
    %c20 = arith.constant 20 : index
    %248 = memref.load %arg1[%c20] : memref<98xf32, #tpu.memory_space<smem>>
    %249 = vector.broadcast %248 : f32 to vector<2x352xf32>
    %250 = arith.mulf %249, %239 : vector<2x352xf32>
    %251 = arith.addf %214, %250 : vector<2x352xf32>
    %c27 = arith.constant 27 : index
    %252 = memref.load %arg1[%c27] : memref<98xf32, #tpu.memory_space<smem>>
    %253 = vector.broadcast %252 : f32 to vector<2x352xf32>
    %254 = arith.mulf %253, %239 : vector<2x352xf32>
    %255 = arith.addf %218, %254 : vector<2x352xf32>
    %c34 = arith.constant 34 : index
    %256 = memref.load %arg1[%c34] : memref<98xf32, #tpu.memory_space<smem>>
    %257 = vector.broadcast %256 : f32 to vector<2x352xf32>
    %258 = arith.mulf %257, %239 : vector<2x352xf32>
    %259 = arith.addf %222, %258 : vector<2x352xf32>
    %c41 = arith.constant 41 : index
    %260 = memref.load %arg1[%c41] : memref<98xf32, #tpu.memory_space<smem>>
    %261 = vector.broadcast %260 : f32 to vector<2x352xf32>
    %262 = arith.mulf %261, %239 : vector<2x352xf32>
    %263 = arith.addf %226, %262 : vector<2x352xf32>
    %c48 = arith.constant 48 : index
    %264 = memref.load %arg1[%c48] : memref<98xf32, #tpu.memory_space<smem>>
    %265 = vector.broadcast %264 : f32 to vector<2x352xf32>
    %266 = arith.mulf %265, %239 : vector<2x352xf32>
    %267 = arith.addf %230, %266 : vector<2x352xf32>
    %cst_22 = arith.constant 0.000000e+00 : f32
    %268 = vector.broadcast %cst_22 : f32 to vector<2x3xf32>
    %269 = vector.extract_strided_slice %7 {offsets = [0, 0], sizes = [2, 349], strides = [1, 1]} : vector<2x352xf32> to vector<2x349xf32>
    %270 = tpu.concatenate %268, %269 in 1 : vector<2x3xf32>, vector<2x349xf32> -> vector<2x352xf32>
    %c3_i32_23 = arith.constant 3 : i32
    %271 = vector.broadcast %c3_i32_23 : i32 to vector<1x352xi32>
    %272 = arith.cmpi sge, %24, %271 : vector<1x352xi32>
    %cst_24 = arith.constant 0.000000e+00 : f32
    %273 = vector.shape_cast %272 : vector<1x352xi1> to vector<1x352xi1>
    %274 = vector.broadcast %273 : vector<1x352xi1> to vector<2x352xi1>
    %275 = vector.broadcast %cst_24 : f32 to vector<2x352xf32>
    %276 = arith.select %274, %270, %275 : vector<2x352xi1>, vector<2x352xf32>
    %c49 = arith.constant 49 : index
    %277 = memref.load %arg1[%c49] : memref<98xf32, #tpu.memory_space<smem>>
    %278 = vector.broadcast %277 : f32 to vector<2x352xf32>
    %279 = arith.mulf %278, %276 : vector<2x352xf32>
    %280 = arith.addf %243, %279 : vector<2x352xf32>
    %c56 = arith.constant 56 : index
    %281 = memref.load %arg1[%c56] : memref<98xf32, #tpu.memory_space<smem>>
    %282 = vector.broadcast %281 : f32 to vector<2x352xf32>
    %283 = arith.mulf %282, %276 : vector<2x352xf32>
    %284 = arith.addf %247, %283 : vector<2x352xf32>
    %c63 = arith.constant 63 : index
    %285 = memref.load %arg1[%c63] : memref<98xf32, #tpu.memory_space<smem>>
    %286 = vector.broadcast %285 : f32 to vector<2x352xf32>
    %287 = arith.mulf %286, %276 : vector<2x352xf32>
    %288 = arith.addf %251, %287 : vector<2x352xf32>
    %c70 = arith.constant 70 : index
    %289 = memref.load %arg1[%c70] : memref<98xf32, #tpu.memory_space<smem>>
    %290 = vector.broadcast %289 : f32 to vector<2x352xf32>
    %291 = arith.mulf %290, %276 : vector<2x352xf32>
    %292 = arith.addf %255, %291 : vector<2x352xf32>
    %c77 = arith.constant 77 : index
    %293 = memref.load %arg1[%c77] : memref<98xf32, #tpu.memory_space<smem>>
    %294 = vector.broadcast %293 : f32 to vector<2x352xf32>
    %295 = arith.mulf %294, %276 : vector<2x352xf32>
    %296 = arith.addf %259, %295 : vector<2x352xf32>
    %c84 = arith.constant 84 : index
    %297 = memref.load %arg1[%c84] : memref<98xf32, #tpu.memory_space<smem>>
    %298 = vector.broadcast %297 : f32 to vector<2x352xf32>
    %299 = arith.mulf %298, %276 : vector<2x352xf32>
    %300 = arith.addf %263, %299 : vector<2x352xf32>
    %c91 = arith.constant 91 : index
    %301 = memref.load %arg1[%c91] : memref<98xf32, #tpu.memory_space<smem>>
    %302 = vector.broadcast %301 : f32 to vector<2x352xf32>
    %303 = arith.mulf %302, %276 : vector<2x352xf32>
    %304 = arith.addf %267, %303 : vector<2x352xf32>
    %cst_25 = arith.constant 0.000000e+00 : f32
    %305 = vector.broadcast %cst_25 : f32 to vector<2x2xf32>
    %306 = vector.extract_strided_slice %7 {offsets = [0, 0], sizes = [2, 350], strides = [1, 1]} : vector<2x352xf32> to vector<2x350xf32>
    %307 = tpu.concatenate %305, %306 in 1 : vector<2x2xf32>, vector<2x350xf32> -> vector<2x352xf32>
    %c2_i32_26 = arith.constant 2 : i32
    %308 = vector.broadcast %c2_i32_26 : i32 to vector<1x352xi32>
    %309 = arith.cmpi sge, %24, %308 : vector<1x352xi32>
    %cst_27 = arith.constant 0.000000e+00 : f32
    %310 = vector.shape_cast %309 : vector<1x352xi1> to vector<1x352xi1>
    %311 = vector.broadcast %310 : vector<1x352xi1> to vector<2x352xi1>
    %312 = vector.broadcast %cst_27 : f32 to vector<2x352xf32>
    %313 = arith.select %311, %307, %312 : vector<2x352xi1>, vector<2x352xf32>
    %c50 = arith.constant 50 : index
    %314 = memref.load %arg1[%c50] : memref<98xf32, #tpu.memory_space<smem>>
    %315 = vector.broadcast %314 : f32 to vector<2x352xf32>
    %316 = arith.mulf %315, %313 : vector<2x352xf32>
    %317 = arith.addf %280, %316 : vector<2x352xf32>
    %c57 = arith.constant 57 : index
    %318 = memref.load %arg1[%c57] : memref<98xf32, #tpu.memory_space<smem>>
    %319 = vector.broadcast %318 : f32 to vector<2x352xf32>
    %320 = arith.mulf %319, %313 : vector<2x352xf32>
    %321 = arith.addf %284, %320 : vector<2x352xf32>
    %c64 = arith.constant 64 : index
    %322 = memref.load %arg1[%c64] : memref<98xf32, #tpu.memory_space<smem>>
    %323 = vector.broadcast %322 : f32 to vector<2x352xf32>
    %324 = arith.mulf %323, %313 : vector<2x352xf32>
    %325 = arith.addf %288, %324 : vector<2x352xf32>
    %c71 = arith.constant 71 : index
    %326 = memref.load %arg1[%c71] : memref<98xf32, #tpu.memory_space<smem>>
    %327 = vector.broadcast %326 : f32 to vector<2x352xf32>
    %328 = arith.mulf %327, %313 : vector<2x352xf32>
    %329 = arith.addf %292, %328 : vector<2x352xf32>
    %c78 = arith.constant 78 : index
    %330 = memref.load %arg1[%c78] : memref<98xf32, #tpu.memory_space<smem>>
    %331 = vector.broadcast %330 : f32 to vector<2x352xf32>
    %332 = arith.mulf %331, %313 : vector<2x352xf32>
    %333 = arith.addf %296, %332 : vector<2x352xf32>
    %c85 = arith.constant 85 : index
    %334 = memref.load %arg1[%c85] : memref<98xf32, #tpu.memory_space<smem>>
    %335 = vector.broadcast %334 : f32 to vector<2x352xf32>
    %336 = arith.mulf %335, %313 : vector<2x352xf32>
    %337 = arith.addf %300, %336 : vector<2x352xf32>
    %c92 = arith.constant 92 : index
    %338 = memref.load %arg1[%c92] : memref<98xf32, #tpu.memory_space<smem>>
    %339 = vector.broadcast %338 : f32 to vector<2x352xf32>
    %340 = arith.mulf %339, %313 : vector<2x352xf32>
    %341 = arith.addf %304, %340 : vector<2x352xf32>
    %cst_28 = arith.constant 0.000000e+00 : f32
    %342 = vector.broadcast %cst_28 : f32 to vector<2x1xf32>
    %343 = vector.extract_strided_slice %7 {offsets = [0, 0], sizes = [2, 351], strides = [1, 1]} : vector<2x352xf32> to vector<2x351xf32>
    %344 = tpu.concatenate %342, %343 in 1 : vector<2x1xf32>, vector<2x351xf32> -> vector<2x352xf32>
    %c1_i32_29 = arith.constant 1 : i32
    %345 = vector.broadcast %c1_i32_29 : i32 to vector<1x352xi32>
    %346 = arith.cmpi sge, %24, %345 : vector<1x352xi32>
    %cst_30 = arith.constant 0.000000e+00 : f32
    %347 = vector.shape_cast %346 : vector<1x352xi1> to vector<1x352xi1>
    %348 = vector.broadcast %347 : vector<1x352xi1> to vector<2x352xi1>
    %349 = vector.broadcast %cst_30 : f32 to vector<2x352xf32>
    %350 = arith.select %348, %344, %349 : vector<2x352xi1>, vector<2x352xf32>
    %c51 = arith.constant 51 : index
    %351 = memref.load %arg1[%c51] : memref<98xf32, #tpu.memory_space<smem>>
    %352 = vector.broadcast %351 : f32 to vector<2x352xf32>
    %353 = arith.mulf %352, %350 : vector<2x352xf32>
    %354 = arith.addf %317, %353 : vector<2x352xf32>
    %c58 = arith.constant 58 : index
    %355 = memref.load %arg1[%c58] : memref<98xf32, #tpu.memory_space<smem>>
    %356 = vector.broadcast %355 : f32 to vector<2x352xf32>
    %357 = arith.mulf %356, %350 : vector<2x352xf32>
    %358 = arith.addf %321, %357 : vector<2x352xf32>
    %c65 = arith.constant 65 : index
    %359 = memref.load %arg1[%c65] : memref<98xf32, #tpu.memory_space<smem>>
    %360 = vector.broadcast %359 : f32 to vector<2x352xf32>
    %361 = arith.mulf %360, %350 : vector<2x352xf32>
    %362 = arith.addf %325, %361 : vector<2x352xf32>
    %c72 = arith.constant 72 : index
    %363 = memref.load %arg1[%c72] : memref<98xf32, #tpu.memory_space<smem>>
    %364 = vector.broadcast %363 : f32 to vector<2x352xf32>
    %365 = arith.mulf %364, %350 : vector<2x352xf32>
    %366 = arith.addf %329, %365 : vector<2x352xf32>
    %c79 = arith.constant 79 : index
    %367 = memref.load %arg1[%c79] : memref<98xf32, #tpu.memory_space<smem>>
    %368 = vector.broadcast %367 : f32 to vector<2x352xf32>
    %369 = arith.mulf %368, %350 : vector<2x352xf32>
    %370 = arith.addf %333, %369 : vector<2x352xf32>
    %c86 = arith.constant 86 : index
    %371 = memref.load %arg1[%c86] : memref<98xf32, #tpu.memory_space<smem>>
    %372 = vector.broadcast %371 : f32 to vector<2x352xf32>
    %373 = arith.mulf %372, %350 : vector<2x352xf32>
    %374 = arith.addf %337, %373 : vector<2x352xf32>
    %c93 = arith.constant 93 : index
    %375 = memref.load %arg1[%c93] : memref<98xf32, #tpu.memory_space<smem>>
    %376 = vector.broadcast %375 : f32 to vector<2x352xf32>
    %377 = arith.mulf %376, %350 : vector<2x352xf32>
    %378 = arith.addf %341, %377 : vector<2x352xf32>
    %c52 = arith.constant 52 : index
    %379 = memref.load %arg1[%c52] : memref<98xf32, #tpu.memory_space<smem>>
    %380 = vector.broadcast %379 : f32 to vector<2x352xf32>
    %381 = arith.mulf %380, %7 : vector<2x352xf32>
    %382 = arith.addf %354, %381 : vector<2x352xf32>
    %c59 = arith.constant 59 : index
    %383 = memref.load %arg1[%c59] : memref<98xf32, #tpu.memory_space<smem>>
    %384 = vector.broadcast %383 : f32 to vector<2x352xf32>
    %385 = arith.mulf %384, %7 : vector<2x352xf32>
    %386 = arith.addf %358, %385 : vector<2x352xf32>
    %c66 = arith.constant 66 : index
    %387 = memref.load %arg1[%c66] : memref<98xf32, #tpu.memory_space<smem>>
    %388 = vector.broadcast %387 : f32 to vector<2x352xf32>
    %389 = arith.mulf %388, %7 : vector<2x352xf32>
    %390 = arith.addf %362, %389 : vector<2x352xf32>
    %c73 = arith.constant 73 : index
    %391 = memref.load %arg1[%c73] : memref<98xf32, #tpu.memory_space<smem>>
    %392 = vector.broadcast %391 : f32 to vector<2x352xf32>
    %393 = arith.mulf %392, %7 : vector<2x352xf32>
    %394 = arith.addf %366, %393 : vector<2x352xf32>
    %c80 = arith.constant 80 : index
    %395 = memref.load %arg1[%c80] : memref<98xf32, #tpu.memory_space<smem>>
    %396 = vector.broadcast %395 : f32 to vector<2x352xf32>
    %397 = arith.mulf %396, %7 : vector<2x352xf32>
    %398 = arith.addf %370, %397 : vector<2x352xf32>
    %c87 = arith.constant 87 : index
    %399 = memref.load %arg1[%c87] : memref<98xf32, #tpu.memory_space<smem>>
    %400 = vector.broadcast %399 : f32 to vector<2x352xf32>
    %401 = arith.mulf %400, %7 : vector<2x352xf32>
    %402 = arith.addf %374, %401 : vector<2x352xf32>
    %c94 = arith.constant 94 : index
    %403 = memref.load %arg1[%c94] : memref<98xf32, #tpu.memory_space<smem>>
    %404 = vector.broadcast %403 : f32 to vector<2x352xf32>
    %405 = arith.mulf %404, %7 : vector<2x352xf32>
    %406 = arith.addf %378, %405 : vector<2x352xf32>
    %cst_31 = arith.constant 0.000000e+00 : f32
    %407 = vector.broadcast %cst_31 : f32 to vector<2x1xf32>
    %408 = vector.extract_strided_slice %7 {offsets = [0, 1], sizes = [2, 351], strides = [1, 1]} : vector<2x352xf32> to vector<2x351xf32>
    %409 = tpu.concatenate %408, %407 in 1 : vector<2x351xf32>, vector<2x1xf32> -> vector<2x352xf32>
    %c15_i32_32 = arith.constant 15 : i32
    %410 = vector.broadcast %c15_i32_32 : i32 to vector<1x352xi32>
    %411 = arith.cmpi slt, %24, %410 : vector<1x352xi32>
    %cst_33 = arith.constant 0.000000e+00 : f32
    %412 = vector.shape_cast %411 : vector<1x352xi1> to vector<1x352xi1>
    %413 = vector.broadcast %412 : vector<1x352xi1> to vector<2x352xi1>
    %414 = vector.broadcast %cst_33 : f32 to vector<2x352xf32>
    %415 = arith.select %413, %409, %414 : vector<2x352xi1>, vector<2x352xf32>
    %c53 = arith.constant 53 : index
    %416 = memref.load %arg1[%c53] : memref<98xf32, #tpu.memory_space<smem>>
    %417 = vector.broadcast %416 : f32 to vector<2x352xf32>
    %418 = arith.mulf %417, %415 : vector<2x352xf32>
    %419 = arith.addf %382, %418 : vector<2x352xf32>
    %c60 = arith.constant 60 : index
    %420 = memref.load %arg1[%c60] : memref<98xf32, #tpu.memory_space<smem>>
    %421 = vector.broadcast %420 : f32 to vector<2x352xf32>
    %422 = arith.mulf %421, %415 : vector<2x352xf32>
    %423 = arith.addf %386, %422 : vector<2x352xf32>
    %c67 = arith.constant 67 : index
    %424 = memref.load %arg1[%c67] : memref<98xf32, #tpu.memory_space<smem>>
    %425 = vector.broadcast %424 : f32 to vector<2x352xf32>
    %426 = arith.mulf %425, %415 : vector<2x352xf32>
    %427 = arith.addf %390, %426 : vector<2x352xf32>
    %c74 = arith.constant 74 : index
    %428 = memref.load %arg1[%c74] : memref<98xf32, #tpu.memory_space<smem>>
    %429 = vector.broadcast %428 : f32 to vector<2x352xf32>
    %430 = arith.mulf %429, %415 : vector<2x352xf32>
    %431 = arith.addf %394, %430 : vector<2x352xf32>
    %c81 = arith.constant 81 : index
    %432 = memref.load %arg1[%c81] : memref<98xf32, #tpu.memory_space<smem>>
    %433 = vector.broadcast %432 : f32 to vector<2x352xf32>
    %434 = arith.mulf %433, %415 : vector<2x352xf32>
    %435 = arith.addf %398, %434 : vector<2x352xf32>
    %c88 = arith.constant 88 : index
    %436 = memref.load %arg1[%c88] : memref<98xf32, #tpu.memory_space<smem>>
    %437 = vector.broadcast %436 : f32 to vector<2x352xf32>
    %438 = arith.mulf %437, %415 : vector<2x352xf32>
    %439 = arith.addf %402, %438 : vector<2x352xf32>
    %c95 = arith.constant 95 : index
    %440 = memref.load %arg1[%c95] : memref<98xf32, #tpu.memory_space<smem>>
    %441 = vector.broadcast %440 : f32 to vector<2x352xf32>
    %442 = arith.mulf %441, %415 : vector<2x352xf32>
    %443 = arith.addf %406, %442 : vector<2x352xf32>
    %cst_34 = arith.constant 0.000000e+00 : f32
    %444 = vector.broadcast %cst_34 : f32 to vector<2x2xf32>
    %445 = vector.extract_strided_slice %7 {offsets = [0, 2], sizes = [2, 350], strides = [1, 1]} : vector<2x352xf32> to vector<2x350xf32>
    %446 = tpu.concatenate %445, %444 in 1 : vector<2x350xf32>, vector<2x2xf32> -> vector<2x352xf32>
    %c14_i32_35 = arith.constant 14 : i32
    %447 = vector.broadcast %c14_i32_35 : i32 to vector<1x352xi32>
    %448 = arith.cmpi slt, %24, %447 : vector<1x352xi32>
    %cst_36 = arith.constant 0.000000e+00 : f32
    %449 = vector.shape_cast %448 : vector<1x352xi1> to vector<1x352xi1>
    %450 = vector.broadcast %449 : vector<1x352xi1> to vector<2x352xi1>
    %451 = vector.broadcast %cst_36 : f32 to vector<2x352xf32>
    %452 = arith.select %450, %446, %451 : vector<2x352xi1>, vector<2x352xf32>
    %c54 = arith.constant 54 : index
    %453 = memref.load %arg1[%c54] : memref<98xf32, #tpu.memory_space<smem>>
    %454 = vector.broadcast %453 : f32 to vector<2x352xf32>
    %455 = arith.mulf %454, %452 : vector<2x352xf32>
    %456 = arith.addf %419, %455 : vector<2x352xf32>
    %c61 = arith.constant 61 : index
    %457 = memref.load %arg1[%c61] : memref<98xf32, #tpu.memory_space<smem>>
    %458 = vector.broadcast %457 : f32 to vector<2x352xf32>
    %459 = arith.mulf %458, %452 : vector<2x352xf32>
    %460 = arith.addf %423, %459 : vector<2x352xf32>
    %c68 = arith.constant 68 : index
    %461 = memref.load %arg1[%c68] : memref<98xf32, #tpu.memory_space<smem>>
    %462 = vector.broadcast %461 : f32 to vector<2x352xf32>
    %463 = arith.mulf %462, %452 : vector<2x352xf32>
    %464 = arith.addf %427, %463 : vector<2x352xf32>
    %c75 = arith.constant 75 : index
    %465 = memref.load %arg1[%c75] : memref<98xf32, #tpu.memory_space<smem>>
    %466 = vector.broadcast %465 : f32 to vector<2x352xf32>
    %467 = arith.mulf %466, %452 : vector<2x352xf32>
    %468 = arith.addf %431, %467 : vector<2x352xf32>
    %c82 = arith.constant 82 : index
    %469 = memref.load %arg1[%c82] : memref<98xf32, #tpu.memory_space<smem>>
    %470 = vector.broadcast %469 : f32 to vector<2x352xf32>
    %471 = arith.mulf %470, %452 : vector<2x352xf32>
    %472 = arith.addf %435, %471 : vector<2x352xf32>
    %c89 = arith.constant 89 : index
    %473 = memref.load %arg1[%c89] : memref<98xf32, #tpu.memory_space<smem>>
    %474 = vector.broadcast %473 : f32 to vector<2x352xf32>
    %475 = arith.mulf %474, %452 : vector<2x352xf32>
    %476 = arith.addf %439, %475 : vector<2x352xf32>
    %c96 = arith.constant 96 : index
    %477 = memref.load %arg1[%c96] : memref<98xf32, #tpu.memory_space<smem>>
    %478 = vector.broadcast %477 : f32 to vector<2x352xf32>
    %479 = arith.mulf %478, %452 : vector<2x352xf32>
    %480 = arith.addf %443, %479 : vector<2x352xf32>
    %cst_37 = arith.constant 0.000000e+00 : f32
    %481 = vector.broadcast %cst_37 : f32 to vector<2x3xf32>
    %482 = vector.extract_strided_slice %7 {offsets = [0, 3], sizes = [2, 349], strides = [1, 1]} : vector<2x352xf32> to vector<2x349xf32>
    %483 = tpu.concatenate %482, %481 in 1 : vector<2x349xf32>, vector<2x3xf32> -> vector<2x352xf32>
    %c13_i32_38 = arith.constant 13 : i32
    %484 = vector.broadcast %c13_i32_38 : i32 to vector<1x352xi32>
    %485 = arith.cmpi slt, %24, %484 : vector<1x352xi32>
    %cst_39 = arith.constant 0.000000e+00 : f32
    %486 = vector.shape_cast %485 : vector<1x352xi1> to vector<1x352xi1>
    %487 = vector.broadcast %486 : vector<1x352xi1> to vector<2x352xi1>
    %488 = vector.broadcast %cst_39 : f32 to vector<2x352xf32>
    %489 = arith.select %487, %483, %488 : vector<2x352xi1>, vector<2x352xf32>
    %c55 = arith.constant 55 : index
    %490 = memref.load %arg1[%c55] : memref<98xf32, #tpu.memory_space<smem>>
    %491 = vector.broadcast %490 : f32 to vector<2x352xf32>
    %492 = arith.mulf %491, %489 : vector<2x352xf32>
    %493 = arith.addf %456, %492 : vector<2x352xf32>
    %c62 = arith.constant 62 : index
    %494 = memref.load %arg1[%c62] : memref<98xf32, #tpu.memory_space<smem>>
    %495 = vector.broadcast %494 : f32 to vector<2x352xf32>
    %496 = arith.mulf %495, %489 : vector<2x352xf32>
    %497 = arith.addf %460, %496 : vector<2x352xf32>
    %c69 = arith.constant 69 : index
    %498 = memref.load %arg1[%c69] : memref<98xf32, #tpu.memory_space<smem>>
    %499 = vector.broadcast %498 : f32 to vector<2x352xf32>
    %500 = arith.mulf %499, %489 : vector<2x352xf32>
    %501 = arith.addf %464, %500 : vector<2x352xf32>
    %c76 = arith.constant 76 : index
    %502 = memref.load %arg1[%c76] : memref<98xf32, #tpu.memory_space<smem>>
    %503 = vector.broadcast %502 : f32 to vector<2x352xf32>
    %504 = arith.mulf %503, %489 : vector<2x352xf32>
    %505 = arith.addf %468, %504 : vector<2x352xf32>
    %c83 = arith.constant 83 : index
    %506 = memref.load %arg1[%c83] : memref<98xf32, #tpu.memory_space<smem>>
    %507 = vector.broadcast %506 : f32 to vector<2x352xf32>
    %508 = arith.mulf %507, %489 : vector<2x352xf32>
    %509 = arith.addf %472, %508 : vector<2x352xf32>
    %c90 = arith.constant 90 : index
    %510 = memref.load %arg1[%c90] : memref<98xf32, #tpu.memory_space<smem>>
    %511 = vector.broadcast %510 : f32 to vector<2x352xf32>
    %512 = arith.mulf %511, %489 : vector<2x352xf32>
    %513 = arith.addf %476, %512 : vector<2x352xf32>
    %c97 = arith.constant 97 : index
    %514 = memref.load %arg1[%c97] : memref<98xf32, #tpu.memory_space<smem>>
    %515 = vector.broadcast %514 : f32 to vector<2x352xf32>
    %516 = arith.mulf %515, %489 : vector<2x352xf32>
    %517 = arith.addf %480, %516 : vector<2x352xf32>
    %518 = vector.extract_strided_slice %493 {offsets = [0, 0], sizes = [2, 256], strides = [1, 1]} : vector<2x352xf32> to vector<2x256xf32>
    %519 = vector.extract_strided_slice %497 {offsets = [0, 16], sizes = [2, 256], strides = [1, 1]} : vector<2x352xf32> to vector<2x256xf32>
    %520 = arith.addf %518, %519 : vector<2x256xf32>
    %521 = vector.extract_strided_slice %501 {offsets = [0, 32], sizes = [2, 256], strides = [1, 1]} : vector<2x352xf32> to vector<2x256xf32>
    %522 = arith.addf %520, %521 : vector<2x256xf32>
    %523 = vector.extract_strided_slice %505 {offsets = [0, 48], sizes = [2, 256], strides = [1, 1]} : vector<2x352xf32> to vector<2x256xf32>
    %524 = arith.addf %522, %523 : vector<2x256xf32>
    %525 = vector.extract_strided_slice %509 {offsets = [0, 64], sizes = [2, 256], strides = [1, 1]} : vector<2x352xf32> to vector<2x256xf32>
    %526 = arith.addf %524, %525 : vector<2x256xf32>
    %527 = vector.extract_strided_slice %513 {offsets = [0, 80], sizes = [2, 256], strides = [1, 1]} : vector<2x352xf32> to vector<2x256xf32>
    %528 = arith.addf %526, %527 : vector<2x256xf32>
    %529 = vector.extract_strided_slice %517 {offsets = [0, 96], sizes = [2, 256], strides = [1, 1]} : vector<2x352xf32> to vector<2x256xf32>
    %530 = arith.addf %528, %529 : vector<2x256xf32>
    %531 = arith.negf %530 : vector<2x256xf32>
    %532 = math.exp %531 : vector<2x256xf32>
    %cst_40 = arith.constant 1.000000e+00 : f32
    %533 = vector.broadcast %cst_40 : f32 to vector<2x256xf32>
    %534 = arith.addf %533, %532 : vector<2x256xf32>
    %535 = arith.divf %533, %534 : vector<2x256xf32>
    %536 = vector.shape_cast %535 : vector<2x256xf32> to vector<2x1x256xf32>
    %537 = vector.broadcast %536 : vector<2x1x256xf32> to vector<2x4x256xf32>
    %538 = arith.mulf %0, %537 : vector<2x4x256xf32>
    %c0_41 = arith.constant 0 : index
    %c0_42 = arith.constant 0 : index
    %c0_43 = arith.constant 0 : index
    %539 = vector.load %arg3[%c0_41, %c0_42, %c0_43] : memref<2x4x256xf32, #tpu.memory_space<vmem>>, vector<2x4x256xf32>
    tpu.vector_store %arg3[%c0_41, %c0_42, %c0_43], %538 {strides = array<i32>} : memref<2x4x256xf32, #tpu.memory_space<vmem>>, vector<2x4x256xf32>,
    return
  }
  func.func @transform_0(%arg0: i32, %arg1: memref<98xf32, #tpu.memory_space<smem>>) -> (i32, i32, i32) {
    %c0_i32 = arith.constant 0 : i32
    %c0_i32_0 = arith.constant 0 : i32
    %c0_i32_1 = arith.constant 0 : i32
    return %arg0, %c0_i32, %c0_i32_0 : i32, i32, i32
  }
  func.func @transform_1(%arg0: i32, %arg1: memref<98xf32, #tpu.memory_space<smem>>) -> (i32, i32, i32) {
    %c0_i32 = arith.constant 0 : i32
    %c0_i32_0 = arith.constant 0 : i32
    %c0_i32_1 = arith.constant 0 : i32
    return %arg0, %c0_i32, %c0_i32_0 : i32, i32, i32
  }
}

</mosaic_0001>

<bundles_post_ra>
// kernel: tpu_custom_call.1
= control target key start
LH: loop header
LB: loop body
LE: loop exit
PB: predicated region body
PF: predicated region fallthrough
CT: control target
= control target key end

     0   :  { %s3187_s0 = inlined_call_operand.hbm [shape: f32[98], index: 0, kind: input, shape index: {}]   ;;  %s3188_s1 = inlined_call_operand.hbm [shape: f32[2,4,256], index: 1, kind: input, shape index: {}]   ;;  %s3189_s2 = inlined_call_operand.hbm [shape: f32[2,4,256], index: 2, kind: output, shape index: {}]  }
   0x1   :  { %3279 = sst [smem:[#allocation168_spill]] %s3189_s2  ;;  %s1457_s11 = scalar_lea.hbm %s3187_s0, 16 }
   0x2   :  { %p1458_p0 = scmp.ne.s32.totalorder %s3187_s0, %s1457_s11  ;;  %p1461_p1 = scmp.lt.u32.totalorder %s1457_s11, %s3187_s0 }
   0x4   :  { %p1463_p2 = pnand %p1461_p1, %p1458_p0 }
   0x6   :  { %1466 = shalt.err (!%p1463_p2)  }
   0x7   :  { %s1517_s16 = smov [#allocation3]  }
   0x8   :  { %8 = dma.hbm_to_smem %s3187_s0, 16, %s1517_s16, [#allocation2] }
   0x9   :  { %1511 = dma.done.wait [#allocation2], 16 }
   0xa   :  { %1512 = vsyncadd [#allocation2], 4294967280 }
   0xb   :  { %10 = sfence }
   0xc   :  { %11 = vsyncpa [#allocation5], 0 }
   0xd   :  { %12 = vsyncpa [#allocation6], 0  ;;  %s1518_s19 = smov [#allocation4]   ;;  %s1467_s23 = scalar_lea.hbm %s3188_s1, 256 }
   0xe   :  { %s18_s20 = sshll.u32 %s1518_s19, 4  ;;  %p1468_p3 = scmp.ne.s32.totalorder %s3188_s1, %s1467_s23  ;;  %s19_s20 = int_to_ptr.vmem [resolvable:$true] %s18_s20 }
   0xf   :  { %p1471_p4 = scmp.lt.u32.totalorder %s1467_s23, %s3188_s1 }
  0x11   :  { %p1473_p5 = pnand %p1471_p4, %p1468_p3 }
  0x13   :  { %1476 = shalt.err (!%p1473_p5)
}
  0x14   :  { %s1477_s0 = scalar_lea.vmem %s19_s20, 256  ;;  %p1482_p7 = scmp.lt.s32.totalorder %s19_s20, %s19_s20 }
  0x15   :  { %p1478_p6 = scmp.ne.s32.totalorder %s19_s20, %s1477_s0  ;;  %p1483_p8 = scmp.lt.s32.totalorder %s1477_s0, %s1477_s0 }
  0x17   :  { %p1484_p9 = por %p1483_p8, %p1482_p7 }
  0x19   :  { %p1485_p10 = pnand %p1484_p9, %p1478_p6 }
  0x1b   :  { %1488 = shalt.err (!%p1485_p10)
}
  0x1c   :  { %s3190_s28 = smov 128   ;;  %s3191_s29 = smov 8  }
  0x1d   :  { %24 = dma.hbm_to_vmem [thread:$0]  %s3188_s1, 256, %s19_s20, [#allocation5], %s3190_s28, %s3190_s28, %s3191_s29  }
  0x1e   :  { %1513 = dma.done.wait [#allocation5], 256  }
  0x1f   :  { %1514 = vsyncadd [#allocation5], 4294967040  ;;  %vm36_vm0 = vcmask 1043456   ;;  %v28_v0 = vld [vmem:[#allocation4] sm:$0xff]  ;;  %v29_v1 = vld [vmem:[#allocation4 + $0x8] sm:$0xff]  ;;  %vm102_vm1 = vcmask 1041409  }
  0x20   :  { %v70_v2 = vsel %vm36_vm0, %v28_v0, -inf  ;;  %v84_v3 = vsel %vm36_vm0, %v29_v1, -inf  ;;  %v37_v4 = vsel %vm36_vm0, %v28_v0, 0.0  ;;  %v51_v5 = vsel %vm36_vm0, %v29_v1, 0.0  ;;  %s3192_s1 = smov 48   ;;  %s1522_s4 = smov 2  }
  0x21   :  { %v71_v6 = vrot.slane %v70_v2, 4  ;;  %v85_v7 = vrot.slane %v84_v3, 4  ;;  %v38_v8 = vrot.slane %v37_v4, 4  ;;  %v52_v9 = vrot.slane %v51_v5, 4  ;;  %s1523_s5 = smov 3   ;;  %s1524_s6 = smov 127  }
  0x22   :  { %v32_v10 = vcombine.high %v28_v0, %v28_v0  ;;  %v33_v11 = vcombine.high %v29_v1, %v29_v1  ;;  %vm109_vm2 = vcmask 392192   ;;  %s1525_s7 = smov 1   ;;  %s1526_s8 = smov 125   ;;  %vm239_vm3 = vcmask 15360  }
  0x23   :  { %v72_v12 = vmax.f32 %v70_v2, %v71_v6  ;;  %v86_v13 = vmax.f32 %v84_v3, %v85_v7  ;;  %v39_v14 = vadd.f32 %v38_v8, %v37_v4  ;;  %v53_v15 = vadd.f32 %v52_v9, %v51_v5  ;;  %s1527_s9 = smov 126   ;;  %s1661_s10 = sld [smem:[#allocation3 + $0xa]] }
  0x24   :  { %v77_v16 = vsel %vm36_vm0, %v32_v10, -inf  ;;  %v91_v17 = vsel %vm36_vm0, %v33_v11, -inf  ;;  %v44_v18 = vsel %vm36_vm0, %v32_v10, 0.0  ;;  %v58_v19 = vsel %vm36_vm0, %v33_v11, 0.0  ;;  %s1663_s11 = sld [smem:[#allocation3 + $0x11]]  ;;  %s1665_s12 = sld [smem:[#allocation3 + $0x18]] }
  0x25   :  { %v73_v20 = vrot.slane %v72_v12, 2  ;;  %v87_v21 = vrot.slane %v86_v13, 2  ;;  %v40_v22 = vrot.slane %v39_v14, 2  ;;  %v54_v23 = vrot.slane %v53_v15, 2  ;;  %s1667_s13 = sld [smem:[#allocation3 + $0x1f]]  ;;  %s1669_s14 = sld [smem:[#allocation3 + $0x26]] }
  0x26   :  { %v78_v24 = vrot.slane %v77_v16, 4  ;;  %v92_v25 = vrot.slane %v91_v17, 4  ;;  %v45_v26 = vrot.slane %v44_v18, 4  ;;  %v59_v27 = vrot.slane %v58_v19, 4  ;;  %s1675_s15 = sld [smem:[#allocation3 + $0x2d]]  ;;  %s1677_s16 = sld [smem:[#allocation3 + $0x3]] }
  0x27   :  { %v74_v28 = vmax.f32 %v72_v12, %v73_v20  ;;  %v88_v29 = vmax.f32 %v86_v13, %v87_v21  ;;  %v41_v30 = vadd.f32 %v40_v22, %v39_v14  ;;  %v55_v31 = vadd.f32 %v54_v23, %v53_v15  ;;  %s1679_s17 = sld [smem:[#allocation3 + $0x42]]  ;;  %s1681_s18 = sld [smem:[#allocation3 + $0x3b]] }
  0x28   :  { %v79_v32 = vmax.f32 %v77_v16, %v78_v24  ;;  %v93_v33 = vmax.f32 %v91_v17, %v92_v25  ;;  %v46_v34 = vadd.f32 %v45_v26, %v44_v18  ;;  %v60_v35 = vadd.f32 %v59_v27, %v58_v19  ;;  %s1683_s19 = sld [smem:[#allocation3 + $0x50]]  ;;  %s1685_s20 = sld [smem:[#allocation3 + $0x49]] }
  0x29   :  { %v75_v36 = vrot.slane %v74_v28, 1  ;;  %v89_v37 = vrot.slane %v88_v29, 1  ;;  %v42_v38 = vrot.slane %v41_v30, 1  ;;  %v56_v39 = vrot.slane %v55_v31, 1  ;;  %s1687_s21 = sld [smem:[#allocation3 + $0x5e]]  ;;  %s1689_s22 = sld [smem:[#allocation3 + $0x57]] }
  0x2a   :  { %v80_v40 = vrot.slane %v79_v32, 2  ;;  %v94_v41 = vrot.slane %v93_v33, 2  ;;  %v47_v42 = vrot.slane %v46_v34, 2  ;;  %v61_v43 = vrot.slane %v60_v35, 2  ;;  %s1691_s23 = sld [smem:[#allocation3 + $0x32]]  ;;  %s1693_s24 = sld [smem:[#allocation3 + $0x34]] }
  0x2b   :  { %v76_v44 = vmax.f32 %v74_v28, %v75_v36  ;;  %v90_v45 = vmax.f32 %v88_v29, %v89_v37  ;;  %v43_v46 = vadd.f32 %v42_v38, %v41_v30  ;;  %v57_v47 = vadd.f32 %v56_v39, %v55_v31  ;;  %s1695_s25 = sld [smem:[#allocation3 + $0x31]]  ;;  %s1697_s26 = sld [smem:[#allocation3 + $0x38]] }
  0x2c   :  { %v81_v48 = vmax.f32 %v79_v32, %v80_v40  ;;  %v95_v49 = vmax.f32 %v93_v33, %v94_v41  ;;  %v48_v50 = vadd.f32 %v47_v42, %v46_v34  ;;  %v62_v51 = vadd.f32 %v61_v43, %v60_v35  ;;  %s1699_s27 = sld [smem:[#allocation3 + $0x3f]]  ;;  %s1701_s0 = sld [smem:[#allocation3 + $0x46]] }
  0x2d   :  { %v120_v52 = vsel %vm102_vm1, %v90_v45, %v76_v44  ;;  %v66_v53 = vmul.f32 0.25, %v43_v46  ;;  %v68_v54 = vmul.f32 0.25, %v57_v47  ;;  %s1703_s30 = sld [smem:[#allocation3 + $0x4d]]  ;;  %s1705_s3 = sld [smem:[#allocation3 + $0x54]]  ;;  %v3202_v14 = vlaneseq }
  0x2e   :  { %122 = vrot.lane.b32.xlu1 %v120_v52, %s3192_s1  ;;  %v82_v55 = vrot.slane %v81_v48, 1  ;;  %v96_v56 = vrot.slane %v95_v49, 1  ;;  %v49_v57 = vrot.slane %v48_v50, 1  ;;  %v63_v58 = vrot.slane %v62_v51, 1  ;;  %s1719_s28 = sld [smem:[#allocation3 + $0x5c]]  ;;  %s1721_s29 = sld [smem:[#allocation3 + $0x3a]] }
  0x2f   :  { %v103_v59 = vsel %vm102_vm1, %v68_v54, %v66_v53  ;;  %s1725_s2 = sld [smem:[#allocation3 + $0x41]]  ;;  %v133_v15 = vand.u32 127, %v3202_v14  ;;  %v1749_v16 = vstv %s1661_s10  ;;  %v1752_v17 = vstv %s1663_s11  ;;  %s1771_s10 = sld [smem:[#allocation3 + $0x8]] }
  0x30   :  { %105 = vrot.lane.b32.xlu0 %v103_v59, %s3192_s1  ;;  %v83_v60 = vmax.f32 %v81_v48, %v82_v55  ;;  %v97_v61 = vmax.f32 %v95_v49, %v96_v56  ;;  %v50_v62 = vadd.f32 %v49_v57, %v48_v50  ;;  %v64_v63 = vadd.f32 %v63_v58, %v62_v51  ;;  %3281 = sst [smem:[#allocation12_spill]] %s1691_s23  ;;  %s1773_s11 = sld [smem:[#allocation3 + $0xf]] }
  0x31   :  { %3282 = sst [smem:[#allocation13_spill]] %s1695_s25  ;;  %v1755_v18 = vstv %s1665_s12  ;;  %v1762_v19 = vstv %s1667_s13  ;;  %v1765_v20 = vstv %s1669_s14  ;;  %v1768_v21 = vstv %s1675_s15  ;;  %s1790_s12 = sld [smem:[#allocation3 + $0x16]] }
  0x32   :  { %v121_v0 = vsel %vm102_vm1, %v97_v61, %v83_v60  ;;  %v67_v1 = vmul.f32 0.25, %v50_v62  ;;  %v69_v2 = vmul.f32 0.25, %v64_v63  ;;  %v3203_v22 = vstv %s1677_s16  ;;  %s1792_s14 = sld [smem:[#allocation3 + $0x1d]]  ;;  %s1809_s23 = sld [smem:[#allocation3 + $0x2b]] }
  0x33   :  { %124 = vrot.lane.b32.xlu1 %v121_v0, %s3192_s1  ;;  %v1776_v23 = vstv %s1679_s17  ;;  %v1779_v24 = vstv %s1681_s18  ;;  %v1782_v25 = vstv %s1683_s19  ;;  %v1787_v27 = vand.u32 15, %v133_v15  ;;  %s1807_s19 = sld [smem:[#allocation3 + $0x24]]  ;;  %s1826_s25 = sld [smem:[#allocation3 + $0x10]] }
  0x34   :  { %v104_v3 = vsel %vm102_vm1, %v69_v2, %v67_v1  ;;  %3287 = sst [smem:[#allocation18_spill]] %s1719_s28  ;;  %s1733_s28 = sld [smem:[#allocation3 + $0x56]]  ;;  %v1785_v26 = vstv %s1685_s20  ;;  %v1795_v29 = vstv %s1687_s21  ;;  %v1798_v30 = vstv %s1689_s22 }
  0x35   :  { %107 = vrot.lane.b32.xlu0 %v104_v3, %s3192_s1  ;;  %3288 = sst [smem:[#allocation19_spill]] %s1721_s29  ;;  %s1723_s1 = sld [smem:[#allocation3 + $0x1]]  ;;  %3295 = vst [vmem:[#allocation26_spill] sm:$0xff] %v1787_v27  ;;  %v1802_v32 = vstv %s1697_s26  ;;  %v1805_v33 = vstv %s1699_s27  ;;  %v1813_v35 = vstv %s1701_s0  ;;  %v134_v51 = vadd.s32 128, %v133_v15 }
  0x36   :  { %s1735_s29 = sld [smem:[#allocation3 + $0x5d]]  ;;  %s3302_s20 = sld [smem:[#allocation18_spill]]  ;;  %v1816_v36 = vstv %s1703_s30  ;;  %v1819_v37 = vstv %s1705_s3  ;;  %v1854_v46 = vstv %s1725_s2  ;;  %v135_v55 = vadd.s32 256, %v133_v15 }
  0x37   :  { %3296 = sst [smem:[#allocation27_spill]] %s1790_s12  ;;  %s3303_s12 = sld [smem:[#allocation19_spill]]  ;;  %v1934_v3 = vand.u32 15, %v134_v51  ;;  %vm180_vm4 = vcmask 23552   ;;  %vm246_vm5 = vcmp.ge.s32.totalorder %v1787_v27, 2  ;;  %vm187_vm6 = vcmp.ge.s32.totalorder %v1787_v27, 3 }
  0x38   :  { %s1824_s26 = sld [smem:[#allocation3 + $0x9]]  ;;  %s1840_s0 = sld [smem:[#allocation3 + $0x17]]  ;;  %v1956_v51 = vstv %s1792_s14  ;;  %v1966_v59 = vstv %s1809_s23  ;;  %vm318_vm7 = vcmask 7168   ;;  %vm325_vm8 = vcmp.ge.s32.totalorder %v1787_v27, 1 }
  0x39   :  { %s1842_s30 = sld [smem:[#allocation3 + $0x1e]]  ;;  %s1881_s2 = sld [smem:[#allocation3 + $0x19]]  ;;  %3323 = vst [vmem:[#allocation39_spill] sm:$0xff] %v1934_v3  ;;  %3328 = vst [vmem:[#allocation44_spill] sm:$0xff] %v1956_v51  ;;  %v1972_v47 = vstv %s1826_s25  ;;  %vm188_vm9 = vcmp.ge.s32.totalorder %v1934_v3, 3  ;;  %vm247_vm11 = vcmp.ge.s32.totalorder %v1934_v3, 2 }
  0x3a   :  { %v1873_v52 = vstv %s1733_s28  ;;  %s1907_s28 = sld [smem:[#allocation3 + $0x4]]  ;;  %3330 = vst [vmem:[#allocation46_spill] sm:$0xff] %v1966_v59  ;;  %s1978_s14 = sld [smem:[#allocation3 + $0xd]]  ;;  %vm326_vm14 = vcmp.ge.s32.totalorder %v1934_v3, 1  ;;  %vm457_vm15 = vcmask 777216   ;;  %vm451_vm1 = vcmask 1039360  }
  0x3b   :  { %3289 = sst [smem:[#allocation20_spill]] %s1723_s1  ;;  %s1740_s1 = sld [smem:[#allocation3 + $0x2]] }
  0x3c   :  { %v1848_v44 = vstv %s3302_s20  ;;  %v1876_v53 = vstv %s1735_s29  ;;  %s3317_s29 = sld [smem:[#allocation27_spill]]  ;;  %s1995_s23 = sld [smem:[#allocation3 + $0x1b]] }
  0x3d   :  { %v1851_v45 = vstv %s3303_s12  ;;  %s1870_s12 = sld [smem:[#allocation3 + $0x12]]  ;;  %3310 = vst [vmem:[#allocation28_spill] sm:$0xff] %v1876_v53  ;;  %s2103_s21 = sld [smem:[#allocation3 + $0x4b]] }
  0x3e   :  { %v1969_v48 = vstv %s1824_s26  ;;  %v1983_v31 = vstv %s1840_s0  ;;  %s1997_s25 = sld [smem:[#allocation3 + $0x22]]  ;;  %s2014_s26 = sld [smem:[#allocation3 + $0x29]] }
  0x3f   :  { %3331 = vst [vmem:[#allocation47_spill] sm:$0xff] %v1969_v48  ;;  %3333 = vst [vmem:[#allocation49_spill] sm:$0xff] %v1983_v31  ;;  %v1986_v28 = vstv %s1842_s30  ;;  %s2016_s0 = sld [smem:[#allocation3 + $0x30]]  ;;  %s2035_s30 = sld [smem:[#allocation3 + $0x6]] }
  0x40   :  { %s2101_s22 = sld [smem:[#allocation3 + $0x52]] }
  0x41   :  { %3294 = sst [smem:[#allocation25_spill]] %s1740_s1  ;;  %s1759_s1 = sld [smem:[#allocation3 + $0x2a]] }
  0x42   :  { %v1953_v15 = vstv %s3317_s29  ;;  %s2077_s29 = sld [smem:[#allocation3 + $0x4a]] }
  0x43   :  { %3327 = vst [vmem:[#allocation43_spill] sm:$0xff] %v1953_v15 }
  0x47   :  { %v1919_v0 = vstv %s1759_s1  ;;  %s1946_s1 = sld [smem:[#allocation3 + $0x1a]] }
  0x48   :  { %3321 = vst [vmem:[#allocation37_spill] sm:$0xff] %v1919_v0 }
  0xa0   :  { %v123_v4 = vpop.permute.xlu1 %122 }
  0xa1   :  { %v1594_v5 = vsel %vm109_vm2, 0.0, %v123_v4 }
  0xa2   :  { %756 = vrot.lane.b32.xlu1 %v1594_v5, %s1522_s4  ;;  %687 = vrot.lane.b32.xlu0 %v1594_v5, %s1523_s5  ;;  %v106_v6 = vpop.permute.xlu0 %105  ;;  %v1894_v57 = vmul.f32 %v1776_v23, %v1594_v5  ;;  %v1898_v58 = vmul.f32 %v1779_v24, %v1594_v5  ;;  %v1913_v62 = vmul.f32 %v1782_v25, %v1594_v5 }
  0xa3   :  { %v1603_v7 = vsel %vm109_vm2, 0.0, %v106_v6 }
  0xa4   :  { %3313 = vst [vmem:[#allocation31_spill] sm:$0xff] %v1894_v57  ;;  %3314 = vst [vmem:[#allocation32_spill] sm:$0xff] %v1898_v58  ;;  %v1924_v1 = vmul.f32 %v3203_v22, %v1603_v7  ;;  %v1928_v2 = vmul.f32 %v1749_v16, %v1603_v7 }
  0xa5   :  { %v125_v8 = vpop.permute.xlu1 %124  ;;  %3318 = vst [vmem:[#allocation35_spill] sm:$0xff] %v1913_v62 }
  0xa6   :  { %948 = vrot.lane.b32.xlu1 %v1594_v5, %s1524_s6  ;;  %825 = vrot.lane.b32.xlu0 %v1594_v5, %s1525_s7  ;;  %v1615_v9 = vsel %vm109_vm2, %v125_v8, 0.0  ;;  %v1618_v10 = vsel %vm109_vm2, %v123_v4, %v125_v8  ;;  %3322 = vst [vmem:[#allocation38_spill] sm:$0xff] %v1928_v2  ;;  %v1937_v4 = vstv %s1771_s10  ;;  %v1944_v8 = vmul.f32 %v1752_v17, %v1603_v7  ;;  %s1961_s10 = sld [smem:[#allocation3 + $0x28]] }
  0xa7   :  { %3280 = vst [vmem:[#allocation11_spill] sm:$0xff] %v1618_v10  ;;  %v108_v11 = vpop.permute.xlu0 %107  ;;  %3324 = vst [vmem:[#allocation40_spill] sm:$0xff] %v1937_v4 }
  0xa8   :  { %v1629_v12 = vsel %vm109_vm2, %v108_v11, 0.0  ;;  %v1632_v13 = vsel %vm109_vm2, %v106_v6, %v108_v11  ;;  %v1940_v6 = vstv %s1773_s11  ;;  %3326 = vst [vmem:[#allocation42_spill] sm:$0xff] %v1944_v8  ;;  %v1950_v11 = vand.u32 15, %v135_v55  ;;  %s1963_s11 = sld [smem:[#allocation3 + $0x2f]] }
  0xa9   :  { %3325 = vst [vmem:[#allocation41_spill] sm:$0xff] %v1940_v6  ;;  %v1976_v55 = vmul.f32 %v1749_v16, %v1629_v12  ;;  %v1993_v22 = vmul.f32 %v1752_v17, %v1629_v12  ;;  %v2004_v58 = vmul.f32 %v1755_v18, %v1629_v12  ;;  %v2008_v57 = vmul.f32 %v1762_v19, %v1629_v12 }
  0xaa   :  { %233 = vrot.lane.b32.xlu1 %v1603_v7, %s1522_s4  ;;  %174 = vrot.lane.b32.xlu0 %v1603_v7, %s1523_s5  ;;  %v3339_v8 = vstv %s1677_s16  ;;  %s2055_s16 = sld [smem:[#allocation3 + $0x3c]]  ;;  %vm189_vm10 = vcmp.ge.s32.totalorder %v1950_v11, 3  ;;  %vm248_vm12 = vcmp.ge.s32.totalorder %v1950_v11, 2  ;;  %vm327_vm13 = vcmp.ge.s32.totalorder %v1950_v11, 1 }
  0xab   :  { %3332 = vst [vmem:[#allocation48_spill] sm:$0xff] %v1976_v55  ;;  %3334 = vst [vmem:[#allocation50_spill] sm:$0xff] %v1993_v22  ;;  %v2012_v55 = vmul.f32 %v1765_v20, %v1629_v12  ;;  %v2020_v22 = vmul.f32 %v1768_v21, %v1629_v12  ;;  %v2025_v2 = vmul.f32 %v3339_v8, %v1632_v13  ;;  %vm461_vm0 = vcmp.lt.s32.totalorder %v1950_v11, 15 }
  0xac   :  { %3335 = vst [vmem:[#allocation51_spill] sm:$0xff] %v2004_v58  ;;  %3336 = vst [vmem:[#allocation52_spill] sm:$0xff] %v2008_v57  ;;  %v2029_v58 = vmul.f32 %v1749_v16, %v1632_v13  ;;  %v2033_v57 = vmul.f32 %v1752_v17, %v1632_v13  ;;  %v2045_v8 = vmul.f32 %v1755_v18, %v1632_v13 }
  0xad   :  { %3337 = vst [vmem:[#allocation53_spill] sm:$0xff] %v2012_v55  ;;  %3338 = vst [vmem:[#allocation54_spill] sm:$0xff] %v2020_v22  ;;  %v2049_v16 = vmul.f32 %v1762_v19, %v1603_v7  ;;  %v2053_v17 = vmul.f32 %v1762_v19, %v1632_v13  ;;  %v2073_v19 = vmul.f32 %v1768_v21, %v1632_v13 }
  0xae   :  { %445 = vrot.lane.b32.xlu1 %v1603_v7, %s1524_s6  ;;  %312 = vrot.lane.b32.xlu0 %v1603_v7, %s1525_s7  ;;  %3340 = vst [vmem:[#allocation55_spill] sm:$0xff] %v2025_v2  ;;  %3341 = vst [vmem:[#allocation56_spill] sm:$0xff] %v2029_v58 }
  0xaf   :  { %3342 = vst [vmem:[#allocation57_spill] sm:$0xff] %v2033_v57  ;;  %3343 = vst [vmem:[#allocation58_spill] sm:$0xff] %v2045_v8  ;;  %v2061_v57 = vmul.f32 %v1765_v20, %v1603_v7  ;;  %v2069_v8 = vmul.f32 %v1768_v21, %v1603_v7  ;;  %v2107_v21 = vmul.f32 %v1779_v24, %v1615_v9 }
  0xb0   :  { %3344 = vst [vmem:[#allocation59_spill] sm:$0xff] %v2053_v17  ;;  %3346 = vst [vmem:[#allocation61_spill] sm:$0xff] %v2073_v19  ;;  %v2083_v17 = vmul.f32 %v1785_v26, %v1594_v5  ;;  %v2259_v19 = vstv %s2101_s22 }
  0xb1   :  { %3353 = vst [vmem:[#allocation66_spill] sm:$0xff] %v2107_v21  ;;  %v2213_v21 = vstv %s1978_s14  ;;  %3400 = vst [vmem:[#allocation102_spill] sm:$0xff] %v2259_v19  ;;  %s1530_s14 = smov 64  }
  0xb2   :  { %605 = vrot.lane.b32.xlu1 %v1603_v7, %s1526_s8  ;;  %525 = vrot.lane.b32.xlu0 %v1603_v7, %s1527_s9  ;;  %3347 = vst [vmem:[#allocation62_spill] sm:$0xff] %v2083_v17  ;;  %3382 = vst [vmem:[#allocation90_spill] sm:$0xff] %v2213_v21  ;;  %v2233_v21 = vstv %s2016_s0  ;;  %s3115_s0 = sld [smem:[#allocation3 + $0x36]] }
  0xb3   :  { %3389 = vst [vmem:[#allocation95_spill] sm:$0xff] %v2233_v21 }
  0xb6   :  { %689 = vrot.lane.b32.xlu1 %v1618_v10, %s1523_s5  ;;  %691 = vrot.lane.b32.xlu0 %v1615_v9, %s1523_s5 }
  0xba   :  { %760 = vrot.lane.b32.xlu1 %v1615_v9, %s1522_s4  ;;  %758 = vrot.lane.b32.xlu0 %v1618_v10, %s1522_s4 }
  0xbe   :  { %827 = vrot.lane.b32.xlu1 %v1618_v10, %s1525_s7  ;;  %829 = vrot.lane.b32.xlu0 %v1615_v9, %s1525_s7 }
  0xc2   :  { %178 = vrot.lane.b32.xlu0 %v1629_v12, %s1523_s5  ;;  %176 = vrot.lane.b32.xlu1 %v1632_v13, %s1523_s5  ;;  %s1709_s5 = sld [smem:[#allocation3 + $0x39]] }
  0xc6   :  { %235 = vrot.lane.b32.xlu0 %v1632_v13, %s1522_s4  ;;  %237 = vrot.lane.b32.xlu1 %v1629_v12, %s1522_s4  ;;  %s1707_s4 = sld [smem:[#allocation3 + $0x5b]] }
  0xc8   :  { %3283 = sst [smem:[#allocation14_spill]] %s1709_s5  ;;  %s1727_s5 = sld [smem:[#allocation3]] }
  0xc9   :  { %s3297_s13 = sld [smem:[#allocation14_spill]] }
  0xca   :  { %316 = vrot.lane.b32.xlu0 %v1629_v12, %s1525_s7  ;;  %314 = vrot.lane.b32.xlu1 %v1632_v13, %s1525_s7  ;;  %s1713_s7 = sld [smem:[#allocation3 + $0x47]]  ;;  %3301 = sst [smem:[#allocation14_spill]] %s1807_s19 }
  0xcb   :  { %s3319_s20 = sld [smem:[#allocation14_spill]] }
  0xcc   :  { %v1822_v38 = vstv %s1707_s4  ;;  %s1856_s4 = sld [smem:[#allocation3 + $0x25]] }
  0xce   :  { %447 = vrot.lane.b32.xlu0 %v1632_v13, %s1524_s6  ;;  %449 = vrot.lane.b32.xlu1 %v1629_v12, %s1524_s6  ;;  %3290 = sst [smem:[#allocation21_spill]] %s1727_s5  ;;  %s1742_s5 = sld [smem:[#allocation3 + $0xe]] }
  0xcf   :  { %v1829_v39 = vstv %s3297_s13  ;;  %s2089_s13 = sld [smem:[#allocation3 + $0x5f]]  ;;  %s3422_s22 = sld [smem:[#allocation21_spill]] }
  0xd0   :  { %3284 = sst [smem:[#allocation15_spill]] %s1713_s7  ;;  %s1729_s7 = sld [smem:[#allocation3 + $0x48]] }
  0xd1   :  { %s3298_s15 = sld [smem:[#allocation15_spill]]  ;;  %v1959_v14 = vstv %s3319_s20  ;;  %s2079_s20 = sld [smem:[#allocation3 + $0x3d]] }
  0xd2   :  { %529 = vrot.lane.b32.xlu0 %v1629_v12, %s1527_s9  ;;  %527 = vrot.lane.b32.xlu1 %v1632_v13, %s1527_s9  ;;  %3329 = vst [vmem:[#allocation45_spill] sm:$0xff] %v1959_v14  ;;  %v1989_v34 = vstv %s1856_s4  ;;  %s2057_s4 = sld [smem:[#allocation3 + $0x51]] }
  0xd4   :  { %v1886_v56 = vstv %s1742_s5  ;;  %s1909_s5 = sld [smem:[#allocation3 + $0x5]] }
  0xd5   :  { %3312 = vst [vmem:[#allocation30_spill] sm:$0xff] %v1886_v56  ;;  %3349 = sst [smem:[#allocation15_spill]] %s2089_s13  ;;  %s2121_s13 = sld [smem:[#allocation3 + $0x60]]  ;;  %v3432_v22 = vstv %s3422_s22 }
  0xd6   :  { %607 = vrot.lane.b32.xlu0 %v1632_v13, %s1526_s8  ;;  %609 = vrot.lane.b32.xlu1 %v1629_v12, %s1526_s8  ;;  %3291 = sst [smem:[#allocation22_spill]] %s1729_s7  ;;  %s1744_s7 = sld [smem:[#allocation3 + $0x15]]  ;;  %v2041_v12 = vmul.f32 %v1755_v18, %v1603_v7  ;;  %v2065_v18 = vmul.f32 %v1765_v20, %v1632_v13  ;;  %v2087_v20 = vmul.f32 %v1795_v29, %v1594_v5 }
  0xd7   :  { %s3306_s27 = sld [smem:[#allocation22_spill]]  ;;  %v1835_v41 = vstv %s3298_s15  ;;  %v2093_v7 = vmul.f32 %v1798_v30, %v1594_v5  ;;  %v2097_v13 = vmul.f32 %v1779_v24, %v1618_v10  ;;  %v2127_v24 = vmul.f32 %v1785_v26, %v1615_v9 }
  0xd8   :  { %s1868_s15 = sld [smem:[#allocation3 + $0xb]]  ;;  %3345 = vst [vmem:[#allocation60_spill] sm:$0xff] %v2065_v18  ;;  %3348 = vst [vmem:[#allocation63_spill] sm:$0xff] %v2087_v20  ;;  %v2119_v20 = vmul.f32 %v1785_v26, %v1618_v10  ;;  %v2147_v26 = vmul.f32 %v1798_v30, %v1615_v9  ;;  %v2250_v21 = vstv %s2057_s4  ;;  %v2256_v58 = vstv %s2079_s20 }
  0xd9   :  { %3350 = vst [vmem:[#allocation64_spill] sm:$0xff] %v2093_v7  ;;  %3351 = vst [vmem:[#allocation65_spill] sm:$0xff] %v2097_v13  ;;  %v2111_v7 = vmul.f32 %v1776_v23, %v1615_v9  ;;  %v2115_v13 = vmul.f32 %v1776_v23, %v1618_v10  ;;  %v2135_v23 = vmul.f32 %v1782_v25, %v1618_v10 }
  0xda   :  { %950 = vrot.lane.b32.xlu0 %v1618_v10, %s1524_s6  ;;  %952 = vrot.lane.b32.xlu1 %v1615_v9, %s1524_s6  ;;  %s1711_s6 = sld [smem:[#allocation3 + $0x40]]  ;;  %3356 = vst [vmem:[#allocation69_spill] sm:$0xff] %v2119_v20  ;;  %3359 = vst [vmem:[#allocation70_spill] sm:$0xff] %v2127_v24  ;;  %v2139_v20 = vmul.f32 %v1798_v30, %v1618_v10  ;;  %v2166_v30 = vstv %s1870_s12  ;;  %s2188_s12 = sld [smem:[#allocation3 + $0x33]] }
  0xdb   :  { %3354 = vst [vmem:[#allocation67_spill] sm:$0xff] %v2111_v7  ;;  %3355 = vst [vmem:[#allocation68_spill] sm:$0xff] %v2115_v13  ;;  %v2131_v7 = vmul.f32 %v1782_v25, %v1615_v9  ;;  %v2155_v25 = vmul.f32 %v1795_v29, %v1618_v10 }
  0xdc   :  { %v1902_v60 = vstv %s1744_s7  ;;  %s1930_s7 = sld [smem:[#allocation3 + $0xc]]  ;;  %3361 = vst [vmem:[#allocation72_spill] sm:$0xff] %v2135_v23  ;;  %3362 = vst [vmem:[#allocation73_spill] sm:$0xff] %v2139_v20  ;;  %v3368_v20 = vstv %s1693_s24 }
  0xdd   :  { %v1863_v49 = vstv %s3306_s27  ;;  %3315 = vst [vmem:[#allocation33_spill] sm:$0xff] %v1902_v60  ;;  %s1980_s27 = sld [smem:[#allocation3 + $0x14]]  ;;  %3360 = vst [vmem:[#allocation71_spill] sm:$0xff] %v2131_v7  ;;  %v2151_v7 = vmul.f32 %v1795_v29, %v1615_v9  ;;  %v2160_v23 = vmul.f32 %v3368_v20, %v1594_v5  ;;  %v2210_v20 = vstv %s1963_s11  ;;  %s3404_s11 = sld [smem:[#allocation13_spill]] }
  0xde   :  { %1017 = vrot.lane.b32.xlu0 %v1594_v5, %s1527_s9  ;;  %1019 = vrot.lane.b32.xlu1 %v1618_v10, %s1527_s9  ;;  %3365 = vst [vmem:[#allocation74_spill] sm:$0xff] %v2147_v26  ;;  %3367 = vst [vmem:[#allocation76_spill] sm:$0xff] %v2155_v25  ;;  %v2163_v24 = vstv %s1868_s15  ;;  %v2169_v26 = vstv %s1881_s2  ;;  %s2186_s15 = sld [smem:[#allocation3 + $0x4c]]  ;;  %s2202_s2 = sld [smem:[#allocation3 + $0x61]] }
  0xdf   :  { %3366 = vst [vmem:[#allocation75_spill] sm:$0xff] %v2151_v7  ;;  %3369 = vst [vmem:[#allocation77_spill] sm:$0xff] %v2160_v23  ;;  %v2197_v7 = vstv %s1946_s1 }
  0xe0   :  { %v1832_v40 = vstv %s1711_s6  ;;  %s1858_s6 = sld [smem:[#allocation3 + $0x2c]]  ;;  %3370 = vst [vmem:[#allocation78_spill] sm:$0xff] %v2163_v24  ;;  %3371 = vst [vmem:[#allocation79_spill] sm:$0xff] %v2166_v30 }
  0xe1   :  { %3372 = vst [vmem:[#allocation80_spill] sm:$0xff] %v2169_v26  ;;  %3378 = vst [vmem:[#allocation86_spill] sm:$0xff] %v2197_v7 }
  0xe2   :  { %1021 = vrot.lane.b32.xlu0 %v1615_v9, %s1527_s9  ;;  %1086 = vrot.lane.b32.xlu1 %v1594_v5, %s1526_s8  ;;  %s1717_s9 = sld [smem:[#allocation3 + $0x55]]  ;;  %v2191_v23 = vstv %s1930_s7  ;;  %3381 = vst [vmem:[#allocation89_spill] sm:$0xff] %v2210_v20  ;;  %v2230_v20 = vstv %s2014_s26  ;;  %3397 = vst [vmem:[#allocation99_spill] sm:$0xff] %v2250_v21 }
  0xe3   :  { %3376 = vst [vmem:[#allocation84_spill] sm:$0xff] %v2191_v23  ;;  %v2216_v17 = vstv %s1980_s27  ;;  %3388 = vst [vmem:[#allocation94_spill] sm:$0xff] %v2230_v20  ;;  %v2253_v20 = vstv %s2077_s29  ;;  %s1531_s27 = smov 80   ;;  %s3099_s26 = sld [smem:[#allocation3 + $0x35]] }
  0xe4   :  { %3383 = vst [vmem:[#allocation91_spill] sm:$0xff] %v2216_v17  ;;  %3398 = vst [vmem:[#allocation100_spill] sm:$0xff] %v2253_v20  ;;  %v2297_v26 = vstv %s2202_s2 }
  0xe5   :  { %3399 = vst [vmem:[#allocation101_spill] sm:$0xff] %v2256_v58  ;;  %3413 = vst [vmem:[#allocation113_spill] sm:$0xff] %v2297_v26 }
  0xe6   :  { %1088 = vrot.lane.b32.xlu0 %v1618_v10, %s1526_s8  ;;  %1090 = vrot.lane.b32.xlu1 %v1615_v9, %s1526_s8  ;;  %s1715_s8 = sld [smem:[#allocation3 + $0x4e]]  ;;  %v2000_v62 = vstv %s1858_s6  ;;  %s2075_s6 = sld [smem:[#allocation3 + $0x44]]  ;;  %v2207_v10 = vstv %s1961_s10 }
  0xe7   :  { %3380 = vst [vmem:[#allocation88_spill] sm:$0xff] %v2207_v10  ;;  %v2224_v10 = vstv %s1995_s23  ;;  %s3402_s10 = sld [smem:[#allocation12_spill]]  ;;  %s1532_s23 = smov 32  }
  0xe8   :  { %3286 = sst [smem:[#allocation17_spill]] %s1717_s9  ;;  %s1737_s9 = sld [smem:[#allocation3 + $0x7]]  ;;  %3386 = vst [vmem:[#allocation92_spill] sm:$0xff] %v2224_v10 }
  0xe9   :  { %s3300_s18 = sld [smem:[#allocation17_spill]] }
  0xea   :  { %3357 = sst [smem:[#allocation17_spill]] %s2121_s13  ;;  %s2143_s13 = sld [smem:[#allocation3 + $0x59]] }
  0xeb   :  { %s3390_s7 = sld [smem:[#allocation17_spill]] }
  0xec   :  { %3285 = sst [smem:[#allocation16_spill]] %s1715_s8  ;;  %s1731_s8 = sld [smem:[#allocation3 + $0x4f]]  ;;  %v2244_v10 = vstv %s2075_s6 }
  0xed   :  { %s3299_s17 = sld [smem:[#allocation16_spill]]  ;;  %3394 = vst [vmem:[#allocation97_spill] sm:$0xff] %v2244_v10  ;;  %v3415_v30 = vstv %s3402_s10 }
  0xee   :  { %3293 = sst [smem:[#allocation24_spill]] %s1737_s9  ;;  %s1757_s9 = sld [smem:[#allocation3 + $0x23]] }
  0xef   :  { %s3308_s3 = sld [smem:[#allocation24_spill]]  ;;  %v1845_v43 = vstv %s3300_s18  ;;  %s1888_s18 = sld [smem:[#allocation3 + $0x27]] }
  0xf0   :  { %3352 = sst [smem:[#allocation16_spill]] %s2103_s21  ;;  %s2123_s21 = sld [smem:[#allocation3 + $0x58]] }
  0xf1   :  { %3364 = sst [smem:[#allocation22_spill]] %s2143_s13  ;;  %s2174_s13 = sld [smem:[#allocation3 + $0x3e]]  ;;  %v2276_v58 = vstv %s3390_s7 }
  0xf2   :  { %3292 = sst [smem:[#allocation23_spill]] %s1731_s8  ;;  %3406 = vst [vmem:[#allocation106_spill] sm:$0xff] %v2276_v58  ;;  %v3417_v58 = vstv %s3404_s11 }
  0xf3   :  { %s1746_s8 = sld [smem:[#allocation3 + $0x1c]]  ;;  %v1838_v42 = vstv %s3299_s17  ;;  %s1883_s17 = sld [smem:[#allocation3 + $0x20]] }
  0xf4   :  { %s3307_s19 = sld [smem:[#allocation23_spill]]  ;;  %v1916_v63 = vstv %s1757_s9  ;;  %s1948_s9 = sld [smem:[#allocation3 + $0x21]] }
  0xf5   :  { %v1879_v54 = vstv %s3308_s3  ;;  %3320 = vst [vmem:[#allocation36_spill] sm:$0xff] %v1916_v63  ;;  %s2037_s3 = sld [smem:[#allocation3 + $0x43]]  ;;  %v2179_v5 = vstv %s1888_s18  ;;  %s3384_s18 = sld [smem:[#allocation16_spill]] }
  0xf6   :  { %3311 = vst [vmem:[#allocation29_spill] sm:$0xff] %v1879_v54  ;;  %3358 = sst [smem:[#allocation18_spill]] %s2123_s21  ;;  %s2141_s21 = sld [smem:[#allocation3 + $0x45]]  ;;  %3374 = vst [vmem:[#allocation82_spill] sm:$0xff] %v2179_v5 }
  0xf9   :  { %v1905_v61 = vstv %s1746_s8  ;;  %s1932_s8 = sld [smem:[#allocation3 + $0x13]]  ;;  %v2172_v9 = vstv %s1883_s17  ;;  %s2204_s17 = sld [smem:[#allocation3 + $0x5a]] }
  0xfa   :  { %v1866_v50 = vstv %s3307_s19  ;;  %s1890_s19 = sld [smem:[#allocation3 + $0x2e]]  ;;  %3316 = vst [vmem:[#allocation34_spill] sm:$0xff] %v1905_v61  ;;  %3373 = vst [vmem:[#allocation81_spill] sm:$0xff] %v2172_v9  ;;  %v2200_v13 = vstv %s1948_s9  ;;  %s3396_s9 = sld [smem:[#allocation22_spill]] }
  0xfb   :  { %3379 = vst [vmem:[#allocation87_spill] sm:$0xff] %v2200_v13  ;;  %v2241_v18 = vstv %s2037_s3 }
  0xfc   :  { %3363 = sst [smem:[#allocation19_spill]] %s2141_s21  ;;  %s2176_s21 = sld [smem:[#allocation3 + $0x53]]  ;;  %3393 = vst [vmem:[#allocation96_spill] sm:$0xff] %v2241_v18  ;;  %v2262_v18 = vstv %s3384_s18 }
  0xfd   :  { %s3392_s1 = sld [smem:[#allocation19_spill]]  ;;  %3401 = vst [vmem:[#allocation103_spill] sm:$0xff] %v2262_v18  ;;  %v2285_v18 = vstv %s2174_s13  ;;  %s3434_s13 = sld [smem:[#allocation25_spill]] }
  0xfe   :  { %3409 = vst [vmem:[#allocation109_spill] sm:$0xff] %v2285_v18 }
  0xff   :  { %v2194_v25 = vstv %s1932_s8  ;;  %s3391_s8 = sld [smem:[#allocation18_spill]] }
 0x100   :  { %v2182_v29 = vstv %s1890_s19  ;;  %3377 = vst [vmem:[#allocation85_spill] sm:$0xff] %v2194_v25  ;;  %s3385_s19 = sld [smem:[#allocation15_spill]]  ;;  %v2227_v25 = vstv %s1997_s25  ;;  %v2291_v9 = vstv %s3396_s9  ;;  %s3608_s25 = smov 48  }
 0x101   :  { %3375 = vst [vmem:[#allocation83_spill] sm:$0xff] %v2182_v29  ;;  %3387 = vst [vmem:[#allocation93_spill] sm:$0xff] %v2227_v25  ;;  %v2247_v25 = vstv %s2055_s16 }
 0x102   :  { %3395 = vst [vmem:[#allocation98_spill] sm:$0xff] %v2247_v25  ;;  %3411 = vst [vmem:[#allocation111_spill] sm:$0xff] %v2291_v9 }
 0x103   :  { %v2282_v5 = vstv %s3392_s1 }
 0x104   :  { %3408 = vst [vmem:[#allocation108_spill] sm:$0xff] %v2282_v5 }
 0x105   :  { %v2279_v19 = vstv %s3391_s8 }
 0x106   :  { %v2265_v10 = vstv %s3385_s19  ;;  %3407 = vst [vmem:[#allocation107_spill] sm:$0xff] %v2279_v19 }
 0x107   :  { %3403 = vst [vmem:[#allocation104_spill] sm:$0xff] %v2265_v10  ;;  %v2288_v10 = vstv %s2176_s21  ;;  %s3421_s21 = sld [smem:[#allocation20_spill]] }
 0x108   :  { %3410 = vst [vmem:[#allocation110_spill] sm:$0xff] %v2288_v10 }
 0x114   :  { %v2218_v13 = vpop.permute.xlu1 %756  ;;  %v2220_v7 = vpop.permute.xlu0 %687 }
 0x115   :  { %v767_v17 = vsel %vm239_vm3, 0.0, %v2218_v13  ;;  %v698_v23 = vsel %vm180_vm4, 0.0, %v2220_v7 }
 0x116   :  { %v768_v25 = vsel %vm246_vm5, %v767_v17, 0.0  ;;  %v699_v21 = vsel %vm187_vm6, %v698_v23, 0.0  ;;  %v2294_v17 = vstv %s2186_s15  ;;  %v2300_v23 = vstv %s2204_s17 }
 0x117   :  { %3412 = vst [vmem:[#allocation112_spill] sm:$0xff] %v2294_v17  ;;  %3414 = vst [vmem:[#allocation114_spill] sm:$0xff] %v2300_v23  ;;  %v2305_v24 = vmul.f32 %v3415_v30, %v768_v25  ;;  %v2309_v19 = vmul.f32 %v3417_v58, %v699_v21  ;;  %v2312_v5 = vmul.f32 %v1802_v32, %v699_v21 }
 0x118   :  { %v2271_v20 = vpop.permute.xlu1 %948  ;;  %v2273_v29 = vpop.permute.xlu0 %825  ;;  %v2315_v10 = vmul.f32 %v1805_v33, %v699_v21  ;;  %v2324_v30 = vmul.f32 %v1813_v35, %v699_v21  ;;  %v2327_v58 = vmul.f32 %v1816_v36, %v699_v21  ;;  %v2337_v17 = vmul.f32 %v1822_v38, %v699_v21 }
 0x119   :  { %3405 = vst [vmem:[#allocation105_spill] sm:$0xff] %v2271_v20  ;;  %3416 = vst [vmem:[#allocation115_spill] sm:$0xff] %v2305_v24  ;;  %v836_v9 = vsel %vm318_vm7, 0.0, %v2273_v29  ;;  %v2330_v24 = vmul.f32 %v1819_v37, %v699_v21  ;;  %v2340_v18 = vmul.f32 %v1832_v40, %v768_v25  ;;  %v3431_v21 = vstv %s3421_s21 }
 0x11a   :  { %3418 = vst [vmem:[#allocation116_spill] sm:$0xff] %v2309_v19  ;;  %3419 = vst [vmem:[#allocation117_spill] sm:$0xff] %v2312_v5  ;;  %v2350_v5 = vmul.f32 %v1838_v42, %v768_v25 }
 0x11b   :  { %3420 = vst [vmem:[#allocation118_spill] sm:$0xff] %v2315_v10  ;;  %3424 = vst [vmem:[#allocation120_spill] sm:$0xff] %v2324_v30  ;;  %v2354_v10 = vsel %vm325_vm8, %v836_v9, 0.0  ;;  %v2371_v9 = vmul.f32 %v1848_v44, %v768_v25 }
 0x11c   :  { %v2319_v26 = vpop.permute.xlu1 %233  ;;  %v2321_v20 = vpop.permute.xlu0 %174  ;;  %3425 = vst [vmem:[#allocation121_spill] sm:$0xff] %v2327_v58  ;;  %3426 = vst [vmem:[#allocation122_spill] sm:$0xff] %v2330_v24  ;;  %v2347_v24 = vmul.f32 %v1829_v39, %v768_v25 }
 0x11d   :  { %3423 = vst [vmem:[#allocation119_spill] sm:$0xff] %v2319_v26  ;;  %v245_v19 = vsel %vm239_vm3, 0.0, %v2319_v26  ;;  %v186_v23 = vsel %vm180_vm4, 0.0, %v2321_v20  ;;  %3427 = vst [vmem:[#allocation123_spill] sm:$0xff] %v2337_v17 }
 0x11e   :  { %3428 = vst [vmem:[#allocation124_spill] sm:$0xff] %v2340_v18  ;;  %v255_v30 = vsel %vm246_vm5, %v245_v19, 0.0  ;;  %v196_v58 = vsel %vm187_vm6, %v186_v23, 0.0  ;;  %3429 = vst [vmem:[#allocation125_spill] sm:$0xff] %v2347_v24  ;;  %v2362_v19 = vmul.f32 %v1835_v41, %v768_v25  ;;  %vm531_vm5 = vcmask 1031168  }
 0x11f   :  { %3430 = vst [vmem:[#allocation126_spill] sm:$0xff] %v2350_v5  ;;  %v260_v17 = vmul.f32 %v3431_v21, %v255_v30  ;;  %v201_v18 = vmul.f32 %v3432_v22, %v196_v58  ;;  %v205_v5 = vmul.f32 %v1879_v54, %v196_v58  ;;  %v210_v55 = vmul.f32 %v1886_v56, %v196_v58 }
 0x120   :  { %3433 = vst [vmem:[#allocation127_spill] sm:$0xff] %v2362_v19  ;;  %v2364_v23 = vpop.permute.xlu1 %445  ;;  %v2366_v24 = vpop.permute.xlu0 %312  ;;  %3437 = vst [vmem:[#allocation130_spill] sm:$0xff] %v2371_v9  ;;  %v2374_v21 = vmul.f32 %v1845_v43, %v768_v25  ;;  %v215_v19 = vmul.f32 %v1902_v60, %v196_v58  ;;  %v220_v56 = vmul.f32 %v1905_v61, %v196_v58 }
 0x121   :  { %3435 = vst [vmem:[#allocation128_spill] sm:$0xff] %v2364_v23  ;;  %3436 = vst [vmem:[#allocation129_spill] sm:$0xff] %v2366_v24  ;;  %v262_v22 = vadd.f32 %v260_v17, %v201_v18  ;;  %v324_v2 = vsel %vm318_vm7, 0.0, %v2366_v24  ;;  %v266_v23 = vmul.f32 %v1937_v4, %v255_v30  ;;  %v274_v9 = vmul.f32 %v1940_v6, %v255_v30 }
 0x122   :  { %3438 = vst [vmem:[#allocation131_spill] sm:$0xff] %v2374_v21  ;;  %v334_v26 = vsel %vm325_vm8, %v324_v2, 0.0  ;;  %v282_v25 = vmul.f32 %v1953_v15, %v255_v30  ;;  %v3439_v21 = vstv %s3434_s13  ;;  %v225_v17 = vmul.f32 %v1916_v63, %v196_v58 }
 0x123   :  { %v339_v18 = vmul.f32 %v3439_v21, %v334_v26  ;;  %v290_v24 = vmul.f32 %v1956_v51, %v255_v30  ;;  %v298_v54 = vmul.f32 %v1959_v14, %v255_v30  ;;  %v230_v2 = vmul.f32 %v1919_v0, %v196_v58 }
 0x124   :  { %v2391_v60 = vpop.permute.xlu1 %605  ;;  %v2393_v4 = vpop.permute.xlu0 %525  ;;  %v306_v27 = vmul.f32 %v1966_v59, %v255_v30  ;;  %v345_v21 = vmul.f32 %v1969_v48, %v334_v26  ;;  %v2402_v15 = vmul.f32 %v1854_v46, %v2354_v10  ;;  %v269_v14 = vadd.f32 %v266_v23, %v205_v5 }
 0x125   :  { %3440 = vst [vmem:[#allocation132_spill] sm:$0xff] %v2391_v60  ;;  %3441 = vst [vmem:[#allocation133_spill] sm:$0xff] %v2393_v4  ;;  %v341_v51 = vadd.f32 %v339_v18, %v262_v22  ;;  %v353_v60 = vmul.f32 %v1972_v47, %v334_v26  ;;  %v361_v4 = vmul.f32 %v1983_v31, %v334_v26  ;;  %vm540_vm8 = vcmp.lt.s32.totalorder %v1934_v3, 14 }
 0x126   :  { %3442 = vst [vmem:[#allocation134_spill] sm:$0xff] %v2402_v15  ;;  %v277_v6 = vadd.f32 %v274_v9, %v210_v55  ;;  %v285_v63 = vadd.f32 %v282_v25, %v215_v19  ;;  %v369_v61 = vmul.f32 %v1986_v28, %v334_v26  ;;  %v377_v58 = vmul.f32 %v1989_v34, %v334_v26 }
 0x127   :  { %v293_v0 = vadd.f32 %v290_v24, %v220_v56  ;;  %v301_v30 = vadd.f32 %v298_v54, %v225_v17  ;;  %v385_v48 = vmul.f32 %v2000_v62, %v334_v26  ;;  %v2410_v59 = vadd.f32 %v1924_v1, %v341_v51  ;;  %v3450_v24 = vld [vmem:[#allocation38_spill] sm:$0xff] }
 0x128   :  { %v690_v15 = vpop.permute.xlu1 %689  ;;  %v692_v22 = vpop.permute.xlu0 %691  ;;  %v309_v5 = vadd.f32 %v306_v27, %v230_v2  ;;  %v348_v23 = vadd.f32 %v345_v21, %v269_v14  ;;  %v356_v18 = vadd.f32 %v353_v60, %v277_v6  ;;  %v364_v31 = vadd.f32 %v361_v4, %v285_v63 }
 0x129   :  { %v693_v55 = vsel %vm180_vm4, %v2220_v7, %v690_v15  ;;  %v694_v19 = vsel %vm180_vm4, %v690_v15, %v692_v22  ;;  %v372_v54 = vadd.f32 %v369_v61, %v293_v0  ;;  %v380_v56 = vadd.f32 %v377_v58, %v301_v30 }
 0x12a   :  { %v700_v1 = vsel %vm188_vm9, %v693_v55, 0.0  ;;  %v2421_v14 = vmul.f32 %v1851_v45, %v2354_v10  ;;  %v2425_v27 = vmul.f32 %v1866_v50, %v2354_v10  ;;  %v2429_v60 = vmul.f32 %v1863_v49, %v2354_v10 }
 0x12b   :  { %v388_v61 = vadd.f32 %v385_v48, %v309_v5  ;;  %v2433_v63 = vmul.f32 %v1876_v53, %v2354_v10  ;;  %v2437_v0 = vmul.f32 %v1873_v52, %v2354_v10  ;;  %v3448_v4 = vstv %s2188_s12  ;;  %v3451_v48 = vld [vmem:[#allocation42_spill] sm:$0xff] }
 0x12c   :  { %3443 = vst [vmem:[#allocation135_spill] sm:$0xff] %v2421_v14  ;;  %3444 = vst [vmem:[#allocation136_spill] sm:$0xff] %v2425_v27  ;;  %v2442_v6 = vmul.f32 %v3448_v4, %v2354_v10  ;;  %v701_v15 = vsel %vm189_vm10, %v694_v19, 0.0  ;;  %v761_v51 = vpop.permute.xlu1 %760  ;;  %v759_v7 = vpop.permute.xlu0 %758  ;;  %v2447_v26 = vadd.f32 %v3450_v24, %v348_v23  ;;  %v2450_v9 = vadd.f32 %v3451_v48, %v356_v18 }
 0x12d   :  { %3445 = vst [vmem:[#allocation137_spill] sm:$0xff] %v2429_v60  ;;  %3446 = vst [vmem:[#allocation138_spill] sm:$0xff] %v2433_v63  ;;  %v2453_v25 = vadd.f32 %v2041_v12, %v364_v31  ;;  %v3452_v17 = vstv %s3404_s11  ;;  %v2460_v10 = vmul.f32 %v1802_v32, %v700_v1  ;;  %v2463_v21 = vadd.f32 %v2049_v16, %v372_v54 }
 0x12e   :  { %3447 = vst [vmem:[#allocation139_spill] sm:$0xff] %v2437_v0  ;;  %3449 = vst [vmem:[#allocation140_spill] sm:$0xff] %v2442_v6  ;;  %v2457_v2 = vmul.f32 %v3452_v17, %v700_v1  ;;  %v2466_v58 = vadd.f32 %v2061_v57, %v380_v56  ;;  %v2469_v30 = vmul.f32 %v1805_v33, %v700_v1 }
 0x12f   :  { %3454 = vst [vmem:[#allocation42_spill] sm:$0xff] %v2460_v10  ;;  %v2472_v22 = vmul.f32 %v1813_v35, %v700_v1  ;;  %v762_v31 = vsel %vm239_vm3, %v2218_v13, %v759_v7  ;;  %v763_v12 = vsel %vm239_vm3, %v759_v7, %v761_v51  ;;  %v2478_v5 = vmul.f32 %v1816_v36, %v700_v1 }
 0x130   :  { %3453 = vst [vmem:[#allocation38_spill] sm:$0xff] %v2457_v2  ;;  %3455 = vst [vmem:[#allocation141_spill] sm:$0xff] %v2469_v30  ;;  %v2481_v16 = vmul.f32 %v1819_v37, %v700_v1  ;;  %v2485_v57 = vsel %vm247_vm11, %v762_v31, 0.0  ;;  %v770_v23 = vsel %vm248_vm12, %v763_v12, 0.0  ;;  %v2490_v18 = vmul.f32 %v1822_v38, %v700_v1  ;;  %v828_v54 = vpop.permute.xlu1 %827  ;;  %v830_v56 = vpop.permute.xlu0 %829  ;;  %v3492_v30 = vld [vmem:[#allocation41_spill] sm:$0xff] }
 0x131   :  { %3456 = vst [vmem:[#allocation142_spill] sm:$0xff] %v2472_v22  ;;  %3457 = vst [vmem:[#allocation143_spill] sm:$0xff] %v2478_v5  ;;  %v2493_v13 = vmul.f32 %v1802_v32, %v701_v15  ;;  %v2496_v55 = vmul.f32 %v1805_v33, %v701_v15  ;;  %v2499_v19 = vmul.f32 %v1813_v35, %v701_v15 }
 0x132   :  { %3458 = vst [vmem:[#allocation144_spill] sm:$0xff] %v2481_v16  ;;  %3459 = vst [vmem:[#allocation145_spill] sm:$0xff] %v2485_v57  ;;  %v2502_v4 = vmul.f32 %v1816_v36, %v701_v15  ;;  %v2505_v51 = vmul.f32 %v1819_v37, %v701_v15  ;;  %v2508_v1 = vmul.f32 %v1822_v38, %v701_v15 }
 0x133   :  { %3460 = vst [vmem:[#allocation146_spill] sm:$0xff] %v2490_v18  ;;  %v2511_v32 = vadd.f32 %v2069_v8, %v388_v61  ;;  %v2515_v33 = vmul.f32 %v1829_v39, %v2485_v57  ;;  %v2518_v35 = vmul.f32 %v1829_v39, %v770_v23  ;;  %v2522_v36 = vmul.f32 %v1832_v40, %v2485_v57  ;;  %v3483_v18 = vld [vmem:[#allocation29_spill] sm:$0xff] }
 0x134   :  { %v2525_v37 = vmul.f32 %v1832_v40, %v770_v23  ;;  %v2529_v38 = vmul.f32 %v1835_v41, %v2485_v57  ;;  %v2532_v8 = vmul.f32 %v1835_v41, %v770_v23  ;;  %v831_v61 = vsel %vm318_vm7, %v2273_v29, %v828_v54  ;;  %v177_v24 = vpop.permute.xlu1 %176  ;;  %v179_v48 = vpop.permute.xlu0 %178 }
 0x135   :  { %3461 = vst [vmem:[#allocation147_spill] sm:$0xff] %v2515_v33  ;;  %3462 = vst [vmem:[#allocation148_spill] sm:$0xff] %v2518_v35  ;;  %v832_v39 = vsel %vm318_vm7, %v828_v54, %v830_v56  ;;  %v2539_v15 = vmul.f32 %v1838_v42, %v2485_v57  ;;  %v2542_v7 = vmul.f32 %v1838_v42, %v770_v23  ;;  %v2562_v42 = vsel %vm326_vm14, %v831_v61, 0.0 }
 0x136   :  { %3463 = vst [vmem:[#allocation149_spill] sm:$0xff] %v2522_v36  ;;  %3464 = vst [vmem:[#allocation150_spill] sm:$0xff] %v2525_v37  ;;  %v2546_v40 = vmul.f32 %v1845_v43, %v2485_v57  ;;  %v839_v41 = vsel %vm327_vm13, %v832_v39, 0.0  ;;  %v2551_v29 = vmul.f32 %v1845_v43, %v770_v23  ;;  %v2555_v17 = vmul.f32 %v1848_v44, %v2485_v57  ;;  %v3494_v37 = vld [vmem:[#allocation44_spill] sm:$0xff] }
 0x137   :  { %3465 = vst [vmem:[#allocation151_spill] sm:$0xff] %v2529_v38  ;;  %3466 = vst [vmem:[#allocation152_spill] sm:$0xff] %v2532_v8  ;;  %v2558_v31 = vmul.f32 %v1848_v44, %v770_v23  ;;  %v2565_v12 = vmul.f32 %v1851_v45, %v839_v41  ;;  %v2568_v54 = vmul.f32 %v1854_v46, %v839_v41 }
 0x138   :  { %3467 = vst [vmem:[#allocation153_spill] sm:$0xff] %v2539_v15  ;;  %3468 = vst [vmem:[#allocation154_spill] sm:$0xff] %v2542_v7  ;;  %v181_v43 = vsel %vm180_vm4, %v2321_v20, %v177_v24  ;;  %v182_v56 = vsel %vm180_vm4, %v177_v24, %v179_v48  ;;  %v2574_v39 = vmul.f32 %v1863_v49, %v839_v41  ;;  %v238_v20 = vpop.permute.xlu1 %237  ;;  %v236_v24 = vpop.permute.xlu0 %235  ;;  %v3488_v15 = vld [vmem:[#allocation37_spill] sm:$0xff]  ;;  %vm460_vm4 = vcmp.lt.s32.totalorder %v1934_v3, 15 }
 0x139   :  { %3469 = vst [vmem:[#allocation155_spill] sm:$0xff] %v2546_v40  ;;  %3470 = vst [vmem:[#allocation156_spill] sm:$0xff] %v2551_v29  ;;  %v2577_v44 = vmul.f32 %v1866_v50, %v839_v41  ;;  %v197_v23 = vsel %vm188_vm9, %v181_v43, 0.0  ;;  %v198_v61 = vsel %vm189_vm10, %v182_v56, 0.0  ;;  %v2584_v2 = vmul.f32 %v1873_v52, %v839_v41  ;;  %v3485_v29 = vld [vmem:[#allocation33_spill] sm:$0xff]  ;;  %v3487_v40 = vld [vmem:[#allocation36_spill] sm:$0xff] }
 0x13a   :  { %3471 = vst [vmem:[#allocation157_spill] sm:$0xff] %v2555_v17  ;;  %3472 = vst [vmem:[#allocation158_spill] sm:$0xff] %v2558_v31  ;;  %v2587_v6 = vmul.f32 %v1876_v53, %v839_v41  ;;  %v2591_v48 = vmul.f32 %v1851_v45, %v2562_v42  ;;  %v2595_v57 = vmul.f32 %v1854_v46, %v2562_v42  ;;  %v3482_v43 = vstv %s3422_s22  ;;  %v3484_v31 = vld [vmem:[#allocation30_spill] sm:$0xff] }
 0x13b   :  { %3473 = vst [vmem:[#allocation159_spill] sm:$0xff] %v2562_v42  ;;  %3474 = vst [vmem:[#allocation160_spill] sm:$0xff] %v2565_v12  ;;  %v202_v17 = vmul.f32 %v3482_v43, %v197_v23  ;;  %v206_v56 = vmul.f32 %v3483_v18, %v197_v23  ;;  %v216_v41 = vmul.f32 %v3485_v29, %v197_v23  ;;  %v3486_v53 = vld [vmem:[#allocation34_spill] sm:$0xff]  ;;  %v3489_v43 = vld [vmem:[#allocation119_spill] sm:$0xff]  ;;  %vm541_vm9 = vcmp.lt.s32.totalorder %v1950_v11, 14 }
 0x13c   :  { %3475 = vst [vmem:[#allocation161_spill] sm:$0xff] %v2568_v54  ;;  %3476 = vst [vmem:[#allocation162_spill] sm:$0xff] %v2574_v39  ;;  %v226_v16 = vmul.f32 %v3487_v40, %v197_v23  ;;  %v231_v45 = vmul.f32 %v3488_v15, %v197_v23  ;;  %v207_v5 = vmul.f32 %v3483_v18, %v198_v61  ;;  %v3490_v18 = vstv %s3421_s21  ;;  %v315_v12 = vpop.permute.xlu1 %314 }
 0x13d   :  { %3477 = vst [vmem:[#allocation163_spill] sm:$0xff] %v2577_v44  ;;  %3478 = vst [vmem:[#allocation164_spill] sm:$0xff] %v2584_v2  ;;  %v211_v2 = vmul.f32 %v3484_v31, %v197_v23  ;;  %v212_v46 = vmul.f32 %v3484_v31, %v198_v61  ;;  %v217_v44 = vmul.f32 %v3485_v29, %v198_v61  ;;  %v3491_v31 = vld [vmem:[#allocation40_spill] sm:$0xff]  ;;  %vm617_vm10 = vcmask 760832  }
 0x13e   :  { %3479 = vst [vmem:[#allocation165_spill] sm:$0xff] %v2587_v6  ;;  %3480 = vst [vmem:[#allocation166_spill] sm:$0xff] %v2591_v48  ;;  %v221_v6 = vmul.f32 %v3486_v53, %v197_v23  ;;  %v240_v7 = vsel %vm239_vm3, %v3489_v43, %v236_v24  ;;  %v241_v39 = vsel %vm239_vm3, %v236_v24, %v238_v20  ;;  %v3493_v24 = vld [vmem:[#allocation43_spill] sm:$0xff] }
 0x13f   :  { %3481 = vst [vmem:[#allocation167_spill] sm:$0xff] %v2595_v57  ;;  %v222_v8 = vmul.f32 %v3486_v53, %v198_v61  ;;  %v227_v38 = vmul.f32 %v3487_v40, %v198_v61  ;;  %v256_v57 = vsel %vm247_vm11, %v240_v7, 0.0  ;;  %v257_v23 = vsel %vm248_vm12, %v241_v39, 0.0 }
 0x140   :  { %v261_v22 = vmul.f32 %v3490_v18, %v256_v57  ;;  %v267_v36 = vmul.f32 %v3491_v31, %v256_v57  ;;  %v268_v29 = vmul.f32 %v3491_v31, %v257_v23  ;;  %v275_v43 = vmul.f32 %v3492_v30, %v256_v57 }
 0x141   :  { %v232_v20 = vmul.f32 %v3488_v15, %v198_v61  ;;  %v276_v53 = vmul.f32 %v3492_v30, %v257_v23  ;;  %v283_v40 = vmul.f32 %v3493_v24, %v256_v57  ;;  %v284_v54 = vmul.f32 %v3493_v24, %v257_v23  ;;  %v317_v24 = vpop.permute.xlu0 %316 }
 0x142   :  { %v263_v7 = vadd.f32 %v261_v22, %v202_v17  ;;  %v291_v39 = vmul.f32 %v3494_v37, %v256_v57  ;;  %v2629_v18 = vmul.f32 %v1863_v49, %v2562_v42  ;;  %v2633_v31 = vmul.f32 %v1866_v50, %v2562_v42  ;;  %v3497_v17 = vld [vmem:[#allocation45_spill] sm:$0xff]  ;;  %v3498_v49 = vld [vmem:[#allocation46_spill] sm:$0xff] }
 0x143   :  { %v270_v15 = vadd.f32 %v267_v36, %v206_v56  ;;  %v271_v61 = vadd.f32 %v268_v29, %v207_v5  ;;  %v278_v30 = vadd.f32 %v275_v43, %v211_v2  ;;  %v292_v35 = vmul.f32 %v3494_v37, %v257_v23  ;;  %v3499_v36 = vld [vmem:[#allocation129_spill] sm:$0xff] }
 0x144   :  { %3495 = vst [vmem:[#allocation29_spill] sm:$0xff] %v2629_v18  ;;  %3496 = vst [vmem:[#allocation30_spill] sm:$0xff] %v2633_v31  ;;  %v279_v22 = vadd.f32 %v276_v53, %v212_v46  ;;  %v299_v48 = vmul.f32 %v3497_v17, %v256_v57  ;;  %v300_v33 = vmul.f32 %v3497_v17, %v257_v23  ;;  %v3500_v43 = vstv %s3434_s13  ;;  %v3501_v17 = vld [vmem:[#allocation47_spill] sm:$0xff] }
 0x145   :  { %v307_v18 = vmul.f32 %v3498_v49, %v256_v57  ;;  %v286_v0 = vadd.f32 %v283_v40, %v216_v41  ;;  %v287_v10 = vadd.f32 %v284_v54, %v217_v44  ;;  %v308_v50 = vmul.f32 %v3498_v49, %v257_v23  ;;  %v3502_v23 = vld [vmem:[#allocation49_spill] sm:$0xff] }
 0x146   :  { %v319_v2 = vsel %vm318_vm7, %v3499_v36, %v315_v12  ;;  %v294_v5 = vadd.f32 %v291_v39, %v221_v6  ;;  %v295_v37 = vadd.f32 %v292_v35, %v222_v8  ;;  %v320_v46 = vsel %vm318_vm7, %v315_v12, %v317_v24 }
 0x147   :  { %v335_v56 = vsel %vm326_vm14, %v319_v2, 0.0  ;;  %v302_v29 = vadd.f32 %v299_v48, %v226_v16  ;;  %v303_v54 = vadd.f32 %v300_v33, %v227_v38  ;;  %v310_v44 = vadd.f32 %v307_v18, %v231_v45  ;;  %v450_v16 = vpop.permute.xlu1 %449  ;;  %v3503_v33 = vld [vmem:[#allocation26_spill] sm:$0xff] }
 0x148   :  { %v340_v53 = vmul.f32 %v3500_v43, %v335_v56  ;;  %v346_v31 = vmul.f32 %v3501_v17, %v335_v56  ;;  %v354_v57 = vmul.f32 %v1972_v47, %v335_v56  ;;  %v311_v41 = vadd.f32 %v308_v50, %v232_v20 }
 0x149   :  { %v362_v40 = vmul.f32 %v3502_v23, %v335_v56  ;;  %v370_v6 = vmul.f32 %v1986_v28, %v335_v56  ;;  %v378_v35 = vmul.f32 %v1989_v34, %v335_v56  ;;  %v336_v8 = vsel %vm327_vm13, %v320_v46, 0.0 }
 0x14a   :  { %v342_v49 = vadd.f32 %v340_v53, %v263_v7  ;;  %v349_v12 = vadd.f32 %v346_v31, %v270_v15  ;;  %v357_v48 = vadd.f32 %v354_v57, %v278_v30  ;;  %v386_v24 = vmul.f32 %v2000_v62, %v335_v56  ;;  %v3504_v15 = vld [vmem:[#allocation55_spill] sm:$0xff]  ;;  %v3505_v53 = vld [vmem:[#allocation48_spill] sm:$0xff] }
 0x14b   :  { %v365_v39 = vadd.f32 %v362_v40, %v286_v0  ;;  %vm459_vm3 = vcmp.lt.s32.totalorder %v3503_v33, 15  ;;  %v347_v38 = vmul.f32 %v3501_v17, %v336_v8  ;;  %v355_v45 = vmul.f32 %v1972_v47, %v336_v8  ;;  %v3508_v40 = vld [vmem:[#allocation52_spill] sm:$0xff] }
 0x14c   :  { %v363_v20 = vmul.f32 %v3502_v23, %v336_v8  ;;  %v371_v7 = vmul.f32 %v1986_v28, %v336_v8  ;;  %v379_v18 = vmul.f32 %v1989_v34, %v336_v8  ;;  %v387_v31 = vmul.f32 %v2000_v62, %v336_v8  ;;  %v3506_v34 = vld [vmem:[#allocation50_spill] sm:$0xff]  ;;  %v3507_v62 = vld [vmem:[#allocation51_spill] sm:$0xff] }
 0x14d   :  { %v458_v0 = vsel %vm457_vm15, %v450_v16, 0.0  ;;  %v396_v30 = vadd.f32 %v3504_v15, %v342_v49  ;;  %v350_v50 = vadd.f32 %v347_v38, %v271_v61  ;;  %v358_v36 = vadd.f32 %v355_v45, %v279_v22  ;;  %v3509_v49 = vld [vmem:[#allocation53_spill] sm:$0xff]  ;;  %v3510_v61 = vld [vmem:[#allocation54_spill] sm:$0xff] }
 0x14e   :  { %v366_v2 = vadd.f32 %v363_v20, %v287_v10  ;;  %v374_v56 = vadd.f32 %v371_v7, %v295_v37  ;;  %v373_v47 = vadd.f32 %v370_v6, %v294_v5  ;;  %v382_v46 = vadd.f32 %v379_v18, %v303_v54  ;;  %v3511_v10 = vld [vmem:[#allocation78_spill] sm:$0xff]  ;;  %v3512_v5 = vld [vmem:[#allocation79_spill] sm:$0xff]  ;;  %v3513_v6 = vld [vmem:[#allocation80_spill] sm:$0xff] }
 0x14f   :  { %v390_v43 = vadd.f32 %v387_v31, %v311_v41  ;;  %v470_v28 = vsel %vm461_vm0, %v458_v0, 0.0  ;;  %v404_v17 = vadd.f32 %v3505_v53, %v350_v50  ;;  %v412_v57 = vadd.f32 %v3506_v34, %v358_v36  ;;  %v448_v41 = vpop.permute.xlu0 %447  ;;  %v3514_v45 = vld [vmem:[#allocation81_spill] sm:$0xff]  ;;  %v3515_v7 = vld [vmem:[#allocation82_spill] sm:$0xff]  ;;  %v3516_v31 = vld [vmem:[#allocation83_spill] sm:$0xff] }
 0x150   :  { %v420_v23 = vadd.f32 %v3507_v62, %v366_v2  ;;  %v428_v8 = vadd.f32 %v3508_v40, %v374_v56  ;;  %v436_v15 = vadd.f32 %v3509_v49, %v382_v46  ;;  %v481_v37 = vmul.f32 %v3511_v10, %v470_v28  ;;  %v3517_v2 = vld [vmem:[#allocation56_spill] sm:$0xff]  ;;  %v3519_v34 = vld [vmem:[#allocation57_spill] sm:$0xff]  ;;  %v3520_v40 = vld [vmem:[#allocation58_spill] sm:$0xff] }
 0x151   :  { %v444_v22 = vadd.f32 %v3510_v61, %v390_v43  ;;  %v489_v54 = vmul.f32 %v3512_v5, %v470_v28  ;;  %vm539_vm6 = vcmp.lt.s32.totalorder %v3503_v33, 14  ;;  %v497_v38 = vmul.f32 %v3513_v6, %v470_v28 }
 0x152   :  { %v505_v20 = vmul.f32 %v3514_v45, %v470_v28  ;;  %v513_v18 = vmul.f32 %v3515_v7, %v470_v28  ;;  %v521_v0 = vmul.f32 %v3516_v31, %v470_v28  ;;  %v381_v50 = vadd.f32 %v378_v35, %v302_v29 }
 0x153   :  { %v389_v36 = vadd.f32 %v386_v24, %v310_v44  ;;  %v403_v56 = vadd.f32 %v3517_v2, %v349_v12  ;;  %v2684_v46 = vmul.f32 %v1873_v52, %v2562_v42  ;;  %v2686_v43 = vadd.f32 %v481_v37, %v404_v17  ;;  %v3521_v44 = vld [vmem:[#allocation128_spill] sm:$0xff]  ;;  %v528_v52 = vpop.permute.xlu1 %527  ;;  %v3522_v24 = vld [vmem:[#allocation59_spill] sm:$0xff] }
 0x154   :  { %v2688_v53 = vadd.f32 %v489_v54, %v412_v57  ;;  %v411_v62 = vadd.f32 %v3519_v34, %v357_v48  ;;  %v419_v49 = vadd.f32 %v3520_v40, %v365_v39  ;;  %v2692_v61 = vadd.f32 %v497_v38, %v420_v23 }
 0x155   :  { %3518 = vst [vmem:[#allocation33_spill] sm:$0xff] %v2684_v46  ;;  %v2694_v28 = vadd.f32 %v505_v20, %v428_v8  ;;  %v2696_v29 = vadd.f32 %v513_v18, %v436_v15  ;;  %v452_v35 = vsel %vm451_vm1, %v3521_v44, %v448_v41  ;;  %vm537_vm7 = vcmask 769024   ;;  %v3527_v18 = vld [vmem:[#allocation133_spill] sm:$0xff] }
 0x156   :  { %v2700_v12 = vadd.f32 %v521_v0, %v444_v22  ;;  %v427_v17 = vadd.f32 %v3522_v24, %v373_v47  ;;  %v453_v48 = vsel %vm451_vm1, %v448_v41, %v450_v16  ;;  %v468_v39 = vsel %vm459_vm3, %v452_v35, 0.0  ;;  %v530_v22 = vpop.permute.xlu0 %529  ;;  %v3524_v47 = vld [vmem:[#allocation60_spill] sm:$0xff]  ;;  %v3525_v16 = vld [vmem:[#allocation61_spill] sm:$0xff] }
 0x157   :  { %v469_v57 = vsel %vm460_vm4, %v453_v48, 0.0  ;;  %v3523_v23 = vstv %s1907_s28  ;;  %v479_v15 = vmul.f32 %v3511_v10, %v468_v39  ;;  %v487_v37 = vmul.f32 %v3512_v5, %v468_v39  ;;  %s1528_s28 = smov 96  }
 0x158   :  { %v473_v8 = vmul.f32 %v3523_v23, %v468_v39  ;;  %v435_v54 = vadd.f32 %v3524_v47, %v381_v50  ;;  %v443_v41 = vadd.f32 %v3525_v16, %v389_v36  ;;  %v3526_v38 = vmov %v3523_v23  ;;  %v610_v47 = vpop.permute.xlu1 %609 }
 0x159   :  { %v474_v20 = vmul.f32 %v3526_v38, %v469_v57  ;;  %v532_v0 = vsel %vm531_vm5, %v3527_v18, %v528_v52  ;;  %v480_v34 = vmul.f32 %v3511_v10, %v469_v57  ;;  %v488_v40 = vmul.f32 %v3512_v5, %v469_v57  ;;  %v3529_v38 = vld [vmem:[#allocation84_spill] sm:$0xff] }
 0x15a   :  { %v475_v2 = vadd.f32 %v473_v8, %v2410_v59  ;;  %v495_v44 = vmul.f32 %v3513_v6, %v468_v39  ;;  %v482_v24 = vadd.f32 %v479_v15, %v2447_v26  ;;  %v496_v50 = vmul.f32 %v3513_v6, %v469_v57 }
 0x15b   :  { %v476_v35 = vadd.f32 %v474_v20, %v396_v30  ;;  %v533_v36 = vsel %vm531_vm5, %v528_v52, %v530_v22  ;;  %v490_v48 = vadd.f32 %v487_v37, %v2450_v9  ;;  %v503_v23 = vmul.f32 %v3514_v45, %v468_v39  ;;  %v608_v20 = vpop.permute.xlu0 %607 }
 0x15c   :  { %v504_v59 = vmul.f32 %v3514_v45, %v469_v57  ;;  %v511_v10 = vmul.f32 %v3515_v7, %v468_v39  ;;  %v512_v5 = vmul.f32 %v3515_v7, %v469_v57  ;;  %v519_v8 = vmul.f32 %v3516_v31, %v468_v39 }
 0x15d   :  { %v520_v30 = vmul.f32 %v3516_v31, %v469_v57  ;;  %v548_v26 = vsel %vm539_vm6, %v532_v0, 0.0  ;;  %v483_v6 = vadd.f32 %v480_v34, %v403_v56  ;;  %v491_v15 = vadd.f32 %v488_v40, %v411_v62  ;;  %v3530_v62 = vld [vmem:[#allocation85_spill] sm:$0xff] }
 0x15e   :  { %v498_v52 = vadd.f32 %v495_v44, %v2453_v25  ;;  %v3528_v9 = vstv %s1909_s5  ;;  %vm611_vm11 = vcmask 1022976   ;;  %v499_v45 = vadd.f32 %v496_v50, %v419_v49  ;;  %v3534_v40 = vld [vmem:[#allocation89_spill] sm:$0xff]  ;;  %s1529_s5 = smov 112  }
 0x15f   :  { %v553_v37 = vmul.f32 %v3528_v9, %v548_v26  ;;  %v506_v16 = vadd.f32 %v503_v23, %v2463_v21  ;;  %v507_v7 = vadd.f32 %v504_v59, %v427_v17  ;;  %v559_v39 = vmul.f32 %v3529_v38, %v548_v26  ;;  %v3531_v17 = vld [vmem:[#allocation86_spill] sm:$0xff] }
 0x160   :  { %v514_v31 = vadd.f32 %v511_v10, %v2466_v58  ;;  %v2742_v57 = vadd.f32 %v512_v5, %v435_v54  ;;  %v567_v25 = vmul.f32 %v3530_v62, %v548_v26  ;;  %vm621_vm12 = vcmp.lt.s32.totalorder %v1950_v11, 13  ;;  %v3532_v54 = vld [vmem:[#allocation87_spill] sm:$0xff]  ;;  %v3559_v11 = vld [vmem:[#allocation125_spill] sm:$0xff] }
 0x161   :  { %v2744_v56 = vadd.f32 %v553_v37, %v475_v2  ;;  %vm619_vm13 = vcmp.lt.s32.totalorder %v3503_v33, 13  ;;  %vm620_vm14 = vcmp.lt.s32.totalorder %v1934_v3, 13  ;;  %v522_v21 = vadd.f32 %v519_v8, %v2511_v32  ;;  %v3533_v2 = vld [vmem:[#allocation88_spill] sm:$0xff]  ;;  %v2777_v37 = vpop.permute.xlu0 %950 }
 0x162   :  { %v2751_v49 = vadd.f32 %v520_v30, %v443_v41  ;;  %v575_v18 = vmul.f32 %v3531_v17, %v548_v26  ;;  %v538_v58 = vsel %vm537_vm7, %v530_v22, 0.0  ;;  %v583_v0 = vmul.f32 %v3532_v54, %v548_v26 }
 0x163   :  { %v591_v34 = vmul.f32 %v3533_v2, %v548_v26  ;;  %v599_v44 = vmul.f32 %v3534_v40, %v548_v26  ;;  %v549_v50 = vsel %vm540_vm8, %v533_v36, 0.0  ;;  %v2760_v23 = vadd.f32 %v559_v39, %v482_v24  ;;  %v2772_v26 = vpop.permute.xlu1 %952 }
 0x164   :  { %v2762_v59 = vadd.f32 %v567_v25, %v490_v48  ;;  %v550_v32 = vsel %vm541_vm9, %v538_v58, 0.0  ;;  %v3535_v41 = vmov %v3528_v9  ;;  %v560_v22 = vmul.f32 %v3529_v38, %v549_v50 }
 0x165   :  { %v554_v10 = vmul.f32 %v3535_v41, %v549_v50  ;;  %v561_v5 = vmul.f32 %v3529_v38, %v550_v32  ;;  %v568_v8 = vmul.f32 %v3530_v62, %v549_v50  ;;  %v569_v30 = vmul.f32 %v3530_v62, %v550_v32 }
 0x166   :  { %v576_v24 = vmul.f32 %v3531_v17, %v549_v50  ;;  %v577_v48 = vmul.f32 %v3531_v17, %v550_v32  ;;  %v584_v9 = vmul.f32 %v3532_v54, %v549_v50  ;;  %v2779_v39 = vadd.f32 %v575_v18, %v498_v52 }
 0x167   :  { %v556_v36 = vadd.f32 %v554_v10, %v476_v35  ;;  %v2781_v25 = vadd.f32 %v583_v0, %v506_v16  ;;  %v2783_v38 = vadd.f32 %v591_v34, %v514_v31  ;;  %v2785_v58 = vadd.f32 %v599_v44, %v522_v21  ;;  %v3536_v21 = vld [vmem:[#allocation132_spill] sm:$0xff]  ;;  %v2804_v18 = vpop.permute.xlu1 %1019  ;;  %v3537_v0 = vld [vmem:[#allocation90_spill] sm:$0xff]  ;;  %v3538_v34 = vld [vmem:[#allocation91_spill] sm:$0xff] }
 0x168   :  { %v563_v62 = vadd.f32 %v560_v22, %v483_v6  ;;  %v564_v41 = vadd.f32 %v561_v5, %v2686_v43  ;;  %v571_v35 = vadd.f32 %v568_v8, %v491_v15  ;;  %v585_v10 = vmul.f32 %v3532_v54, %v550_v32  ;;  %v3541_v5 = vld [vmem:[#allocation94_spill] sm:$0xff]  ;;  %v3542_v8 = vld [vmem:[#allocation95_spill] sm:$0xff] }
 0x169   :  { %v572_v17 = vadd.f32 %v569_v30, %v2688_v53  ;;  %v2790_v42 = vadd.f32 %v576_v24, %v499_v45  ;;  %v580_v46 = vadd.f32 %v577_v48, %v2692_v61  ;;  %v593_v52 = vmul.f32 %v3533_v2, %v550_v32 }
 0x16a   :  { %v2794_v16 = vadd.f32 %v584_v9, %v507_v7  ;;  %v618_v31 = vsel %vm617_vm10, %v610_v47, 0.0  ;;  %v612_v6 = vsel %vm611_vm11, %v3536_v21, %v608_v20  ;;  %v613_v43 = vsel %vm611_vm11, %v608_v20, %v610_v47  ;;  %v1018_v20 = vpop.permute.xlu0 %1017 }
 0x16b   :  { %v588_v15 = vadd.f32 %v585_v10, %v2694_v28  ;;  %v592_v53 = vmul.f32 %v3533_v2, %v549_v50  ;;  %v600_v45 = vmul.f32 %v3534_v40, %v549_v50  ;;  %v601_v61 = vmul.f32 %v3534_v40, %v550_v32  ;;  %v3539_v50 = vld [vmem:[#allocation92_spill] sm:$0xff]  ;;  %v3540_v32 = vld [vmem:[#allocation93_spill] sm:$0xff] }
 0x16c   :  { %v596_v7 = vadd.f32 %v593_v52, %v2696_v29  ;;  %v630_v54 = vsel %vm621_vm12, %v618_v31, 0.0  ;;  %v628_v47 = vsel %vm619_vm13, %v612_v6, 0.0  ;;  %v629_v28 = vsel %vm620_vm14, %v613_v43, 0.0 }
 0x16d   :  { %v641_v2 = vmul.f32 %v3537_v0, %v630_v54  ;;  %v649_v44 = vmul.f32 %v3538_v34, %v630_v54  ;;  %v657_v40 = vmul.f32 %v3539_v50, %v630_v54  ;;  %v665_v22 = vmul.f32 %v3540_v32, %v630_v54 }
 0x16e   :  { %v673_v29 = vmul.f32 %v3541_v5, %v630_v54  ;;  %v681_v30 = vmul.f32 %v3542_v8, %v630_v54  ;;  %v3543_v24 = vstv %s2035_s30  ;;  %v604_v52 = vadd.f32 %v601_v61, %v2700_v12  ;;  %s3117_s30 = sld [smem:[#allocation3 + $0x37]] }
 0x16f   :  { %v633_v48 = vmul.f32 %v3543_v24, %v628_v47  ;;  %v3544_v9 = vmov %v3543_v24  ;;  %v644_v31 = vadd.f32 %v641_v2, %v564_v41  ;;  %v652_v21 = vadd.f32 %v649_v44, %v572_v17 }
 0x170   :  { %v634_v10 = vmul.f32 %v3544_v9, %v629_v28  ;;  %v660_v6 = vadd.f32 %v657_v40, %v580_v46  ;;  %v595_v43 = vadd.f32 %v592_v53, %v2742_v57  ;;  %v668_v63 = vadd.f32 %v665_v22, %v588_v15  ;;  %v1087_v9 = vpop.permute.xlu1 %1086 }
 0x171   :  { %v2826_v60 = vadd.f32 %v633_v48, %v2744_v56  ;;  %v603_v14 = vadd.f32 %v600_v45, %v2751_v49  ;;  %v676_v54 = vadd.f32 %v673_v29, %v596_v7  ;;  %v684_v3 = vadd.f32 %v681_v30, %v604_v52  ;;  %v3553_v48 = vld [vmem:[#allocation118_spill] sm:$0xff] }
 0x172   :  { %v2828_v27 = vadd.f32 %v634_v10, %v556_v36  ;;  %v959_v24 = vsel %vm457_vm15, %v2772_v26, 0.0  ;;  %v2834_v12 = vadd.f32 %v2493_v13, %v644_v31  ;;  %v2837_v46 = vadd.f32 %v2496_v55, %v652_v21  ;;  %v1022_v36 = vpop.permute.xlu0 %1021  ;;  %v3554_v31 = vld [vmem:[#allocation117_spill] sm:$0xff] }
 0x173   :  { %3545 = vst [vmem:[#allocation34_spill] sm:$0xff] %v2826_v60  ;;  %v639_v57 = vmul.f32 %v3537_v0, %v628_v47  ;;  %v640_v56 = vmul.f32 %v3537_v0, %v629_v28  ;;  %v2842_v41 = vadd.f32 %v2499_v19, %v660_v6  ;;  %v647_v49 = vmul.f32 %v3538_v34, %v628_v47  ;;  %v3555_v6 = vld [vmem:[#allocation124_spill] sm:$0xff] }
 0x174   :  { %3546 = vst [vmem:[#allocation36_spill] sm:$0xff] %v2828_v27  ;;  %v648_v17 = vmul.f32 %v3538_v34, %v629_v28  ;;  %v655_v15 = vmul.f32 %v3539_v50, %v628_v47  ;;  %v2848_v13 = vadd.f32 %v2502_v4, %v668_v63  ;;  %v656_v55 = vmul.f32 %v3539_v50, %v629_v28  ;;  %v3580_v27 = vld [vmem:[#allocation122_spill] sm:$0xff] }
 0x175   :  { %v663_v53 = vmul.f32 %v3540_v32, %v628_v47  ;;  %v664_v45 = vmul.f32 %v3540_v32, %v629_v28  ;;  %v2854_v61 = vadd.f32 %v2505_v51, %v676_v54  ;;  %v2857_v19 = vadd.f32 %v2508_v1, %v684_v3  ;;  %v3549_v3 = vld [vmem:[#allocation105_spill] sm:$0xff]  ;;  %v3556_v54 = vld [vmem:[#allocation96_spill] sm:$0xff] }
 0x176   :  { %v642_v7 = vadd.f32 %v639_v57, %v2760_v23  ;;  %v2860_v0 = vadd.f32 %v640_v56, %v563_v62  ;;  %v650_v2 = vadd.f32 %v647_v49, %v2762_v59  ;;  %v2863_v63 = vadd.f32 %v648_v17, %v571_v35  ;;  %v1091_v23 = vpop.permute.xlu1 %1090  ;;  %v3558_v56 = vld [vmem:[#allocation108_spill] sm:$0xff]  ;;  %v3560_v17 = vld [vmem:[#allocation98_spill] sm:$0xff] }
 0x177   :  { %3547 = vst [vmem:[#allocation37_spill] sm:$0xff] %v2854_v61  ;;  %3548 = vst [vmem:[#allocation119_spill] sm:$0xff] %v2857_v19  ;;  %v671_v4 = vmul.f32 %v3541_v5, %v628_v47  ;;  %v672_v34 = vmul.f32 %v3541_v5, %v629_v28  ;;  %v658_v44 = vadd.f32 %v655_v15, %v2779_v39  ;;  %v2882_v39 = vsel %vm461_vm0, %v959_v24, 0.0  ;;  %v3585_v61 = vld [vmem:[#allocation138_spill] sm:$0xff] }
 0x178   :  { %v679_v51 = vmul.f32 %v3542_v8, %v628_v47  ;;  %v680_v50 = vmul.f32 %v3542_v8, %v629_v28  ;;  %v954_v1 = vsel %vm451_vm1, %v3549_v3, %v2777_v37  ;;  %v2874_v62 = vadd.f32 %v656_v55, %v2790_v42  ;;  %v1089_v47 = vpop.permute.xlu0 %1088  ;;  %v3561_v55 = vld [vmem:[#allocation121_spill] sm:$0xff] }
 0x179   :  { %v666_v59 = vadd.f32 %v663_v53, %v2781_v25  ;;  %v2878_v35 = vadd.f32 %v664_v45, %v2794_v16  ;;  %v674_v28 = vadd.f32 %v671_v4, %v2783_v38  ;;  %v2885_v40 = vadd.f32 %v672_v34, %v595_v43  ;;  %v3562_v45 = vld [vmem:[#allocation134_spill] sm:$0xff]  ;;  %v3564_v34 = vld [vmem:[#allocation109_spill] sm:$0xff] }
 0x17a   :  { %v955_v32 = vsel %vm451_vm1, %v2777_v37, %v2772_v26  ;;  %v1023_v42 = vsel %vm531_vm5, %v1018_v20, %v2804_v18  ;;  %v2894_v25 = vsel %vm459_vm3, %v954_v1, 0.0  ;;  %v1024_v16 = vsel %vm531_vm5, %v2804_v18, %v1022_v36  ;;  %v3566_v1 = vld [vmem:[#allocation135_spill] sm:$0xff]  ;;  %v3571_v20 = vld [vmem:[#allocation110_spill] sm:$0xff] }
 0x17b   :  { %3550 = vst [vmem:[#allocation40_spill] sm:$0xff] %v2885_v40  ;;  %v1028_v22 = vsel %vm537_vm7, %v1022_v36, 0.0  ;;  %v1097_v38 = vsel %vm617_vm10, %v1091_v23, 0.0  ;;  %v682_v5 = vadd.f32 %v679_v51, %v2785_v58  ;;  %v2901_v29 = vadd.f32 %v680_v50, %v603_v14  ;;  %v3565_v50 = vld [vmem:[#allocation120_spill] sm:$0xff] }
 0x17c   :  { %v2905_v26 = vsel %vm539_vm6, %v1023_v42, 0.0  ;;  %v1092_v37 = vsel %vm611_vm11, %v1087_v9, %v1089_v47  ;;  %v2910_v8 = vsel %vm460_vm4, %v955_v32, 0.0  ;;  %v1093_v18 = vsel %vm611_vm11, %v1089_v47, %v1091_v23  ;;  %v3557_v9 = vld [vmem:[#allocation97_spill] sm:$0xff]  ;;  %v3567_v47 = vld [vmem:[#allocation126_spill] sm:$0xff]  ;;  %v3568_v42 = vld [vmem:[#allocation99_spill] sm:$0xff] }
 0x17d   :  { %3551 = vst [vmem:[#allocation41_spill] sm:$0xff] %v2901_v29  ;;  %v2915_v30 = vsel %vm619_vm13, %v1092_v37, 0.0  ;;  %v721_v58 = vadd.f32 %v3553_v48, %v650_v2  ;;  %v2920_v14 = vsel %vm540_vm8, %v1024_v16, 0.0  ;;  %v2924_v10 = vsel %vm541_vm9, %v1028_v22, 0.0  ;;  %v3563_v2 = vld [vmem:[#allocation101_spill] sm:$0xff]  ;;  %v3569_v22 = vld [vmem:[#allocation102_spill] sm:$0xff] }
 0x17e   :  { %v2928_v52 = vsel %vm621_vm12, %v1097_v38, 0.0  ;;  %v713_v21 = vadd.f32 %v3554_v31, %v642_v7  ;;  %v2933_v33 = vsel %vm620_vm14, %v1093_v18, 0.0  ;;  %v979_v24 = vmul.f32 %v3556_v54, %v2894_v25  ;;  %v3570_v38 = vld [vmem:[#allocation31_spill] sm:$0xff]  ;;  %v3584_v29 = vld [vmem:[#allocation62_spill] sm:$0xff] }
 0x17f   :  { %v790_v43 = vadd.f32 %v3555_v6, %v721_v58  ;;  %v1048_v57 = vmul.f32 %v3557_v9, %v2905_v26  ;;  %v1117_v36 = vmul.f32 %v3558_v56, %v2915_v30  ;;  %v971_v15 = vmul.f32 %v3560_v17, %v2894_v25  ;;  %v3572_v48 = vld [vmem:[#allocation127_spill] sm:$0xff] }
 0x180   :  { %v782_v49 = vadd.f32 %v3559_v11, %v713_v21  ;;  %v737_v53 = vadd.f32 %v3561_v55, %v666_v59  ;;  %v1040_v4 = vmul.f32 %v3563_v2, %v2905_v26  ;;  %v1109_v51 = vmul.f32 %v3564_v34, %v2915_v30  ;;  %v3573_v31 = vld [vmem:[#allocation123_spill] sm:$0xff] }
 0x181   :  { %v859_v7 = vadd.f32 %v3562_v45, %v790_v43  ;;  %v729_v3 = vadd.f32 %v3565_v50, %v658_v44  ;;  %v995_v16 = vmul.f32 %v3568_v42, %v2894_v25  ;;  %v1064_v59 = vmul.f32 %v3569_v22, %v2905_v26  ;;  %v3574_v44 = vld [vmem:[#allocation32_spill] sm:$0xff] }
 0x182   :  { %v851_v23 = vadd.f32 %v3566_v1, %v782_v49  ;;  %v806_v32 = vadd.f32 %v3567_v47, %v737_v53  ;;  %v1133_v18 = vmul.f32 %v3571_v20, %v2915_v30  ;;  %v753_v21 = vadd.f32 %v3573_v31, %v682_v5  ;;  %v3575_v43 = vld [vmem:[#allocation136_spill] sm:$0xff]  ;;  %v3577_v53 = vld [vmem:[#allocation103_spill] sm:$0xff]  ;;  %v3578_v1 = vld [vmem:[#allocation137_spill] sm:$0xff] }
 0x183   :  { %v913_v37 = vadd.f32 %v3570_v38, %v859_v7  ;;  %v798_v58 = vadd.f32 %v3572_v48, %v729_v3  ;;  %v3576_v49 = vld [vmem:[#allocation100_spill] sm:$0xff]  ;;  %v1056_v45 = vmul.f32 %v3577_v53, %v2905_v26  ;;  %v3579_v47 = vld [vmem:[#allocation130_spill] sm:$0xff]  ;;  %v745_v60 = vadd.f32 %v3580_v27, %v674_v28  ;;  %v3581_v48 = vld [vmem:[#allocation35_spill] sm:$0xff] }
 0x184   :  { %v905_v6 = vadd.f32 %v3574_v44, %v851_v23  ;;  %v875_v11 = vadd.f32 %v3575_v43, %v806_v32  ;;  %v987_v55 = vmul.f32 %v3576_v49, %v2894_v25  ;;  %v822_v38 = vadd.f32 %v3579_v47, %v753_v21  ;;  %v3582_v23 = vld [vmem:[#allocation112_spill] sm:$0xff]  ;;  %v3587_v27 = vld [vmem:[#allocation106_spill] sm:$0xff] }
 0x185   :  { %v982_v50 = vadd.f32 %v979_v24, %v913_v37  ;;  %v867_v7 = vadd.f32 %v3578_v1, %v798_v58  ;;  %v1125_v31 = vmul.f32 %v3582_v23, %v2915_v30  ;;  %v3583_v32 = vld [vmem:[#allocation104_spill] sm:$0xff]  ;;  %v3586_v37 = vld [vmem:[#allocation131_spill] sm:$0xff]  ;;  %v1080_v28 = vmul.f32 %v3587_v27, %v2905_v26 }
 0x186   :  { %v974_v3 = vadd.f32 %v971_v15, %v905_v6  ;;  %v929_v5 = vadd.f32 %v3581_v48, %v875_v11  ;;  %v1011_v44 = vmul.f32 %v3583_v32, %v2894_v25  ;;  %v891_v24 = vadd.f32 %v3585_v61, %v822_v38  ;;  %v3588_v15 = vld [vmem:[#allocation42_spill] sm:$0xff]  ;;  %v3589_v48 = vld [vmem:[#allocation63_spill] sm:$0xff] }
 0x187   :  { %v1051_v43 = vadd.f32 %v1048_v57, %v982_v50  ;;  %v921_v19 = vadd.f32 %v3584_v29, %v867_v7  ;;  %v814_v58 = vadd.f32 %v3586_v37, %v745_v60  ;;  %v714_v6 = vadd.f32 %v3588_v15, %v2860_v0  ;;  %v3590_v32 = vld [vmem:[#allocation139_spill] sm:$0xff]  ;;  %v3591_v29 = vld [vmem:[#allocation113_spill] sm:$0xff]  ;;  %v3598_v37 = vld [vmem:[#allocation148_spill] sm:$0xff] }
 0x188   :  { %v1043_v1 = vadd.f32 %v1040_v4, %v974_v3  ;;  %v998_v21 = vadd.f32 %v995_v16, %v929_v5  ;;  %v945_v40 = vadd.f32 %v3589_v48, %v891_v24  ;;  %v1149_v61 = vmul.f32 %v3591_v29, %v2915_v30  ;;  %v3592_v60 = vld [vmem:[#allocation107_spill] sm:$0xff]  ;;  %v3596_v5 = vld [vmem:[#allocation114_spill] sm:$0xff]  ;;  %v3599_v15 = vld [vmem:[#allocation65_spill] sm:$0xff] }
 0x189   :  { %v1120_v11 = vadd.f32 %v1117_v36, %v1051_v43  ;;  %v990_v47 = vadd.f32 %v987_v55, %v921_v19  ;;  %v883_v57 = vadd.f32 %v3590_v32, %v814_v58  ;;  %v1003_v4 = vmul.f32 %v3592_v60, %v2894_v25  ;;  %v3593_v16 = vld [vmem:[#allocation147_spill] sm:$0xff]  ;;  %v3594_v36 = vld [vmem:[#allocation64_spill] sm:$0xff]  ;;  %v3597_v43 = vld [vmem:[#allocation166_spill] sm:$0xff] }
 0x18a   :  { %v1112_v50 = vadd.f32 %v1109_v51, %v1043_v1  ;;  %v783_v7 = vadd.f32 %v3593_v16, %v714_v6  ;;  %v1067_v38 = vadd.f32 %v1064_v59, %v998_v21  ;;  %v1014_v0 = vadd.f32 %v1011_v44, %v945_v40  ;;  %v3595_v55 = vld [vmem:[#allocation111_spill] sm:$0xff]  ;;  %v3602_v16 = vld [vmem:[#allocation66_spill] sm:$0xff] }
 0x18b   :  { %1174 = vrot.lane.b32.xlu1 %v1120_v11, %s1528_s28  ;;  %v937_v19 = vadd.f32 %v3594_v36, %v883_v57  ;;  %v1072_v3 = vmul.f32 %v3595_v55, %v2905_v26  ;;  %v1059_v51 = vadd.f32 %v1056_v45, %v990_v47  ;;  %v1141_v32 = vmul.f32 %v3596_v5, %v2915_v30  ;;  %v3600_v11 = vld [vmem:[#allocation160_spill] sm:$0xff]  ;;  %v3601_v57 = vld [vmem:[#allocation150_spill] sm:$0xff] }
 0x18c   :  { %1158 = vrot.lane.b32.xlu0 %v1112_v50, %s1529_s5  ;;  %v852_v24 = vadd.f32 %v3597_v43, %v783_v7  ;;  %v784_v58 = vadd.f32 %v3598_v37, %v2834_v12  ;;  %v1136_v1 = vadd.f32 %v1133_v18, %v1067_v38  ;;  %v972_v40 = vmul.f32 %v3560_v17, %v2910_v8  ;;  %v3606_v37 = vld [vmem:[#allocation149_spill] sm:$0xff] }
 0x18d   :  { %v1006_v59 = vadd.f32 %v1003_v4, %v937_v19  ;;  %v1041_v44 = vmul.f32 %v3563_v2, %v2920_v14  ;;  %v1128_v21 = vadd.f32 %v1125_v31, %v1059_v51  ;;  %v1110_v45 = vmul.f32 %v3564_v34, %v2933_v33 }
 0x18e   :  { %v906_v6 = vadd.f32 %v3599_v15, %v852_v24  ;;  %v853_v47 = vadd.f32 %v3600_v11, %v784_v58  ;;  %v1083_v12 = vadd.f32 %v1080_v28, %v1014_v0  ;;  %v973_v18 = vmul.f32 %v3560_v17, %v2882_v39  ;;  %v3603_v0 = vld [vmem:[#allocation161_spill] sm:$0xff]  ;;  %v3605_v24 = vld [vmem:[#allocation67_spill] sm:$0xff] }
 0x18f   :  { %1206 = vrot.lane.b32.xlu1 %v1136_v1, %s1530_s14  ;;  %v1042_v48 = vmul.f32 %v3563_v2, %v2924_v10  ;;  %v792_v31 = vadd.f32 %v3601_v57, %v2837_v46  ;;  %v1075_v50 = vadd.f32 %v1072_v3, %v1006_v59  ;;  %v1111_v38 = vmul.f32 %v3564_v34, %v2928_v52  ;;  %v3604_v2 = vld [vmem:[#allocation141_spill] sm:$0xff]  ;;  %v3607_v1 = vld [vmem:[#allocation142_spill] sm:$0xff]  ;;  %v3609_v15 = vld [vmem:[#allocation167_spill] sm:$0xff] }
 0x190   :  { %1190 = vrot.lane.b32.xlu0 %v1128_v21, %s1531_s27  ;;  %v975_v4 = vadd.f32 %v972_v40, %v906_v6  ;;  %v907_v7 = vadd.f32 %v3602_v16, %v853_v47  ;;  %v1152_v28 = vadd.f32 %v1149_v61, %v1083_v12  ;;  %v981_v17 = vmul.f32 %v3556_v54, %v2882_v39  ;;  %v3610_v11 = vld [vmem:[#allocation151_spill] sm:$0xff]  ;;  %v3611_v12 = vld [vmem:[#allocation152_spill] sm:$0xff]  ;;  %v3614_v16 = vld [vmem:[#allocation162_spill] sm:$0xff] }
 0x191   :  { %v861_v36 = vadd.f32 %v3603_v0, %v792_v31  ;;  %v722_v19 = vadd.f32 %v3604_v2, %v2863_v63  ;;  %v1144_v46 = vadd.f32 %v1141_v32, %v1075_v50  ;;  %v1050_v3 = vmul.f32 %v3557_v9, %v2924_v10  ;;  %v3613_v50 = vld [vmem:[#allocation29_spill] sm:$0xff] }
 0x192   :  { %v1044_v51 = vadd.f32 %v1041_v44, %v975_v4  ;;  %v976_v43 = vadd.f32 %v973_v18, %v907_v7  ;;  %v1119_v61 = vmul.f32 %v3558_v56, %v2928_v52  ;;  %v730_v59 = vadd.f32 %v3607_v1, %v2874_v62  ;;  %v3616_v2 = vld [vmem:[#allocation69_spill] sm:$0xff]  ;;  %v3620_v1 = vld [vmem:[#allocation71_spill] sm:$0xff] }
 0x193   :  { %1237 = vrot.lane.b32.xlu1 %v1152_v28, %s1532_s23  ;;  %v915_v34 = vadd.f32 %v3605_v24, %v861_v36  ;;  %v791_v58 = vadd.f32 %v3606_v37, %v722_v19  ;;  %v980_v40 = vmul.f32 %v3556_v54, %v2910_v8  ;;  %v1049_v44 = vmul.f32 %v3557_v9, %v2920_v14  ;;  %v3615_v28 = vld [vmem:[#allocation154_spill] sm:$0xff] }
 0x194   :  { %1222 = vrot.lane.b32.xlu0 %v1144_v46, %s3608_s25  ;;  %v1113_v63 = vadd.f32 %v1110_v45, %v1044_v51  ;;  %v1045_v32 = vadd.f32 %v1042_v48, %v976_v43  ;;  %v799_v47 = vadd.f32 %v3610_v11, %v730_v59  ;;  %v800_v18 = vadd.f32 %v3611_v12, %v2842_v41  ;;  %v3612_v48 = vld [vmem:[#allocation68_spill] sm:$0xff]  ;;  %v3617_v46 = vld [vmem:[#allocation70_spill] sm:$0xff] }
 0x195   :  { %v984_v21 = vadd.f32 %v981_v17, %v915_v34  ;;  %v860_v6 = vadd.f32 %v3609_v15, %v791_v58  ;;  %v1118_v62 = vmul.f32 %v3558_v56, %v2933_v33  ;;  %v988_v45 = vmul.f32 %v3576_v49, %v2910_v8  ;;  %v3619_v34 = vld [vmem:[#allocation143_spill] sm:$0xff]  ;;  %v3624_v12 = vld [vmem:[#allocation30_spill] sm:$0xff] }
 0x196   :  { %v1114_v57 = vadd.f32 %v1111_v38, %v1045_v32  ;;  %v1057_v54 = vmul.f32 %v3577_v53, %v2920_v14  ;;  %v868_v4 = vadd.f32 %v3613_v50, %v799_v47  ;;  %v869_v7 = vadd.f32 %v3614_v16, %v800_v18  ;;  %v3629_v16 = vld [vmem:[#allocation33_spill] sm:$0xff] }
 0x197   :  { %1160 = vrot.lane.b32.xlu1 %v1113_v63, %s1529_s5  ;;  %v1053_v9 = vadd.f32 %v1050_v3, %v984_v21  ;;  %v914_v31 = vadd.f32 %v3612_v48, %v860_v6  ;;  %v1126_v41 = vmul.f32 %v3582_v23, %v2933_v33  ;;  %v989_v56 = vmul.f32 %v3576_v49, %v2882_v39  ;;  %v3618_v3 = vld [vmem:[#allocation163_spill] sm:$0xff]  ;;  %v3621_v63 = vld [vmem:[#allocation153_spill] sm:$0xff]  ;;  %v3623_v21 = vld [vmem:[#allocation144_spill] sm:$0xff] }
 0x198   :  { %1162 = vrot.lane.b32.xlu0 %v1114_v57, %s1529_s5  ;;  %v1058_v38 = vmul.f32 %v3577_v53, %v2924_v10  ;;  %v808_v0 = vadd.f32 %v3615_v28, %v2848_v13  ;;  %v922_v19 = vadd.f32 %v3616_v2, %v868_v4  ;;  %v923_v51 = vadd.f32 %v3617_v46, %v869_v7  ;;  %v3628_v4 = vld [vmem:[#allocation72_spill] sm:$0xff]  ;;  %v3633_v46 = vld [vmem:[#allocation73_spill] sm:$0xff] }
 0x199   :  { %v1122_v36 = vadd.f32 %v1119_v61, %v1053_v9  ;;  %v983_v17 = vadd.f32 %v980_v40, %v914_v31  ;;  %v1127_v43 = vmul.f32 %v3582_v23, %v2928_v52  ;;  %v997_v49 = vmul.f32 %v3568_v42, %v2882_v39  ;;  %v3622_v40 = vld [vmem:[#allocation40_spill] sm:$0xff] }
 0x19a   :  { %v877_v24 = vadd.f32 %v3618_v3, %v808_v0  ;;  %v738_v53 = vadd.f32 %v3619_v34, %v2878_v35  ;;  %v991_v61 = vadd.f32 %v988_v45, %v922_v19  ;;  %v992_v37 = vadd.f32 %v989_v56, %v923_v51  ;;  %v3625_v45 = vld [vmem:[#allocation155_spill] sm:$0xff]  ;;  %v3630_v28 = vld [vmem:[#allocation164_spill] sm:$0xff]  ;;  %v3634_v34 = vld [vmem:[#allocation74_spill] sm:$0xff] }
 0x19b   :  { %1178 = vrot.lane.b32.xlu1 %v1122_v36, %s1528_s28  ;;  %v1052_v13 = vadd.f32 %v1049_v44, %v983_v17  ;;  %v1066_v58 = vmul.f32 %v3569_v22, %v2924_v10  ;;  %v1135_v23 = vmul.f32 %v3571_v20, %v2928_v52  ;;  %v746_v15 = vadd.f32 %v3623_v21, %v3622_v40  ;;  %v3631_v36 = vld [vmem:[#allocation119_spill] sm:$0xff]  ;;  %v3632_v17 = vld [vmem:[#allocation158_spill] sm:$0xff]  ;;  %v3640_v21 = vld [vmem:[#allocation157_spill] sm:$0xff] }
 0x19c   :  { %v931_v59 = vadd.f32 %v3620_v1, %v877_v24  ;;  %v807_v32 = vadd.f32 %v3621_v63, %v738_v53  ;;  %v1060_v35 = vadd.f32 %v1057_v54, %v991_v61  ;;  %v996_v44 = vmul.f32 %v3568_v42, %v2910_v8  ;;  %v3626_v54 = vld [vmem:[#allocation37_spill] sm:$0xff]  ;;  %v3627_v42 = vld [vmem:[#allocation156_spill] sm:$0xff] }
 0x19d   :  { %v1121_v6 = vadd.f32 %v1118_v62, %v1052_v13  ;;  %v1065_v11 = vmul.f32 %v3569_v22, %v2920_v14  ;;  %v1134_v57 = vmul.f32 %v3571_v20, %v2933_v33  ;;  %v815_v9 = vadd.f32 %v3625_v45, %v746_v15  ;;  %v3635_v53 = vld [vmem:[#allocation165_spill] sm:$0xff] }
 0x19e   :  { %v1000_v47 = vadd.f32 %v997_v49, %v931_v59  ;;  %v876_v18 = vadd.f32 %v3624_v12, %v807_v32  ;;  %v1129_v48 = vadd.f32 %v1126_v41, %v1060_v35  ;;  %v1061_v31 = vadd.f32 %v1058_v38, %v992_v37  ;;  %v3636_v61 = vld [vmem:[#allocation41_spill] sm:$0xff]  ;;  %v3637_v37 = vld [vmem:[#allocation146_spill] sm:$0xff]  ;;  %v3638_v59 = vld [vmem:[#allocation104_spill] sm:$0xff] }
 0x19f   :  { %1176 = vrot.lane.b32.xlu0 %v1121_v6, %s1528_s28  ;;  %v1004_v62 = vmul.f32 %v3592_v60, %v2910_v8  ;;  %v816_v50 = vadd.f32 %v3627_v42, %v3626_v54  ;;  %v884_v7 = vadd.f32 %v3629_v16, %v815_v9  ;;  %v1073_v56 = vmul.f32 %v3595_v55, %v2920_v14  ;;  %v3639_v32 = vld [vmem:[#allocation75_spill] sm:$0xff]  ;;  %v3642_v35 = vld [vmem:[#allocation28_spill] sm:$0xff] }
 0x1a0   :  { %v930_v22 = vadd.f32 %v3628_v4, %v876_v18  ;;  %v1142_v20 = vmul.f32 %v3596_v5, %v2933_v33  ;;  %1192 = vrot.lane.b32.xlu1 %v1129_v48, %s1531_s27  ;;  %v1130_v41 = vadd.f32 %v1127_v43, %v1061_v31  ;;  %v1069_v38 = vadd.f32 %v1066_v58, %v1000_v47  ;;  %v3641_v6 = vld [vmem:[#allocation159_spill] sm:$0xff]  ;;  %v3644_v18 = vld [vmem:[#allocation116_spill] sm:$0xff] }
 0x1a1   :  { %v885_v0 = vadd.f32 %v3630_v28, %v816_v50  ;;  %v824_v2 = vadd.f32 %v3632_v17, %v3631_v36  ;;  %v938_v51 = vadd.f32 %v3633_v46, %v884_v7  ;;  %v1005_v3 = vmul.f32 %v3592_v60, %v2882_v39  ;;  %v3647_v50 = vld [vmem:[#allocation115_spill] sm:$0xff]  ;;  %v3651_v36 = vld [vmem:[#allocation38_spill] sm:$0xff] }
 0x1a2   :  { %v999_v19 = vadd.f32 %v996_v44, %v930_v22  ;;  %v1074_v24 = vmul.f32 %v3595_v55, %v2924_v10  ;;  %v1138_v49 = vadd.f32 %v1135_v23, %v1069_v38  ;;  %v754_v58 = vadd.f32 %v3637_v37, %v3636_v61  ;;  %v3648_v22 = vld [vmem:[#allocation76_spill] sm:$0xff] }
 0x1a3   :  { %1194 = vrot.lane.b32.xlu0 %v1130_v41, %s1531_s27  ;;  %v939_v43 = vadd.f32 %v3634_v34, %v885_v0  ;;  %v893_v13 = vadd.f32 %v3635_v53, %v824_v2  ;;  %v1007_v60 = vadd.f32 %v1004_v62, %v938_v51  ;;  %v1143_v55 = vmul.f32 %v3596_v5, %v2928_v52  ;;  %v3643_v5 = vld [vmem:[#allocation34_spill] sm:$0xff]  ;;  %v3649_v38 = vld [vmem:[#allocation140_spill] sm:$0xff] }
 0x1a4   :  { %v1068_v1 = vadd.f32 %v1065_v11, %v999_v19  ;;  %v1013_v23 = vmul.f32 %v3638_v59, %v2882_v39  ;;  %1210 = vrot.lane.b32.xlu1 %v1138_v49, %s1530_s14  ;;  %v823_v15 = vadd.f32 %v3640_v21, %v754_v58  ;;  %v889_v44 = vmul.f32 %v3642_v35, %v3641_v6  ;;  %v3645_v39 = vld [vmem:[#allocation145_spill] sm:$0xff]  ;;  %v3650_v0 = vld [vmem:[#allocation36_spill] sm:$0xff]  ;;  %v3654_v53 = vld [vmem:[#allocation11_spill] sm:$0xff] }
 0x1a5   :  { %v1008_v63 = vadd.f32 %v1005_v3, %v939_v43  ;;  %v947_v40 = vadd.f32 %v3639_v32, %v893_v13  ;;  %v1076_v11 = vadd.f32 %v1073_v56, %v1007_v60  ;;  %v1082_v12 = vmul.f32 %v3587_v27, %v2924_v10  ;;  %v3652_v3 = vld [vmem:[#allocation77_spill] sm:$0xff] }
 0x1a6   :  { %v1137_v47 = vadd.f32 %v1134_v57, %v1068_v1  ;;  %v706_v45 = vadd.f32 %v3644_v18, %v3643_v5  ;;  %v3646_v9 = vstv %s3402_s10  ;;  %v1151_v62 = vmul.f32 %v3591_v29, %v2928_v52 }
 0x1a7   :  { %v774_v48 = vmul.f32 %v3646_v9, %v3645_v39  ;;  %v1016_v31 = vadd.f32 %v1013_v23, %v947_v40  ;;  %v892_v54 = vadd.f32 %v889_v44, %v823_v15  ;;  %v1145_v42 = vadd.f32 %v1142_v20, %v1076_v11 }
 0x1a8   :  { %1208 = vrot.lane.b32.xlu0 %v1137_v47, %s1530_s14  ;;  %v1077_v57 = vadd.f32 %v1074_v24, %v1008_v63  ;;  %v775_v4 = vadd.f32 %v3647_v50, %v706_v45  ;;  %v964_v10 = vstv %s3099_s26  ;;  %v1012_v7 = vmul.f32 %v3638_v59, %v2910_v8 }
 0x1a9   :  { %v946_v16 = vadd.f32 %v3648_v22, %v892_v54  ;;  %v1081_v56 = vmul.f32 %v3587_v27, %v2920_v14  ;;  %v1150_v52 = vmul.f32 %v3591_v29, %v2933_v33  ;;  %1224 = vrot.lane.b32.xlu1 %v1145_v42, %s3608_s25  ;;  %v1085_v41 = vadd.f32 %v1082_v12, %v1016_v31 }
 0x1aa   :  { %v1146_v20 = vadd.f32 %v1143_v55, %v1077_v57  ;;  %v844_v28 = vadd.f32 %v3649_v38, %v775_v4  ;;  %v707_v17 = vadd.f32 %v3651_v36, %v3650_v0  ;;  %v965_v19 = vmul.f32 %v964_v10, %v2894_v25 }
 0x1ab   :  { %v1015_v2 = vadd.f32 %v1012_v7, %v946_v16  ;;  %v1033_v46 = vstv %s3115_s0  ;;  %v1102_v51 = vstv %s3117_s30  ;;  %v1154_v27 = vadd.f32 %v1151_v62, %v1085_v41 }
 0x1ac   :  { %1226 = vrot.lane.b32.xlu0 %v1146_v20, %s3608_s25  ;;  %v898_v29 = vadd.f32 %v3652_v3, %v844_v28  ;;  %v776_v24 = vadd.f32 %v774_v48, %v707_v17  ;;  %v3653_v49 = vstv %s2188_s12  ;;  %v3655_v13 = vstv %s1693_s24  ;;  %s1534_s24 = smov [#allocation7]  }
 0x1ad   :  { %v843_v34 = vmul.f32 %v3653_v49, %v3641_v6  ;;  %v1084_v43 = vadd.f32 %v1081_v56, %v1015_v2  ;;  %v897_v61 = vmul.f32 %v3655_v13, %v3654_v53  ;;  %1241 = vrot.lane.b32.xlu1 %v1154_v27, %s1532_s23  ;;  %v1034_v25 = vmul.f32 %v1033_v46, %v2905_v26  ;;  %s1316_s3 = sshll.u32 %s1534_s24, 4  ;;  %s1317_s3 = int_to_ptr.vmem [resolvable:$true] %s1316_s3 }
 0x1ae   :  { %v967_v37 = vadd.f32 %v965_v19, %v898_v29  ;;  %v1103_v58 = vmul.f32 %v1102_v51, %v2915_v30  ;;  %v966_v23 = vmul.f32 %v964_v10, %v2910_v8  ;;  %v1035_v63 = vmul.f32 %v1033_v46, %v2920_v14  ;;  %s1489_s16 = scalar_lea.vmem %s1317_s3, 256  ;;  %p1494_p12 = scmp.lt.s32.totalorder %s1317_s3, %s1317_s3 }
 0x1af   :  { %v845_v1 = vadd.f32 %v843_v34, %v776_v24  ;;  %v1153_v60 = vadd.f32 %v1150_v52, %v1084_v43  ;;  %v1104_v21 = vmul.f32 %v1102_v51, %v2933_v33  ;;  %vm1164_vm15 = vcmask 916480   ;;  %p1490_p11 = scmp.ne.s32.totalorder %s1317_s3, %s1489_s16  ;;  %p1495_p13 = scmp.lt.s32.totalorder %s1489_s16, %s1489_s16 }
 0x1b0   :  { %v1036_v55 = vadd.f32 %v1034_v25, %v967_v37  ;;  %vm1180_vm0 = vcmask 785408   ;;  %vm1196_vm1 = vcmask 654336   ;;  %vm1212_vm3 = vcmask 523264  }
 0x1b1   :  { %v899_v59 = vadd.f32 %v897_v61, %v845_v1  ;;  %1239 = vrot.lane.b32.xlu0 %v1153_v60, %s1532_s23  ;;  %vm1243_vm4 = vcmask 261120   ;;  %v1533_v13 = vmov 1966171168   ;;  %v3656_v25 = vlaneseq  ;;  %p1496_p0 = por %p1495_p13, %p1494_p12 }
 0x1b2   :  { %v1105_v32 = vadd.f32 %v1103_v58, %v1036_v55  ;;  %v1266_v61 = vunpack.c.l.s4 %v1533_v13 }
 0x1b3   :  { %v968_v40 = vadd.f32 %v966_v23, %v899_v59  ;;  %v1269_v58 = vshrl.u32 %v3656_v25, 7  ;;  %p1497_p1 = pnand %p1496_p0, %p1490_p11 }
 0x1b4   :  { %v1267_v37 = vunpack.c.0.s8 %v1266_v61 }
 0x1b5   :  { %v1037_v15 = vadd.f32 %v1035_v63, %v968_v40  ;;  %v1289_v63 = vsub.s32 0, %v1269_v58 }
 0x1b6   :  { %v1270_v60 = vsub.s32 %v1267_v37, %v1269_v58 }
 0x1b7   :  { %v1106_v6 = vadd.f32 %v1104_v21, %v1037_v15 }
 0x1fd   :  { %v1175_v35 = vpop.permute.xlu1 %1174 }
 0x1fe   :  { %v1159_v26 = vpop.permute.xlu0 %1158 }
 0x201   :  { %v1207_v44 = vpop.permute.xlu1 %1206 }
 0x202   :  { %v1191_v30 = vpop.permute.xlu0 %1190 }
 0x205   :  { %v1238_v47 = vpop.permute.xlu1 %1237 }
 0x206   :  { %v1223_v11 = vpop.permute.xlu0 %1222 }
 0x209   :  { %v1161_v12 = vpop.permute.xlu1 %1160 }
 0x20a   :  { %v1163_v5 = vpop.permute.xlu0 %1162  ;;  %v1165_v9 = vsel %vm1164_vm15, %v1159_v26, %v1161_v12 }
 0x20b   :  { %v1166_v48 = vsel %vm1164_vm15, %v1161_v12, %v1163_v5  ;;  %v1169_v54 = vadd.f32 %v1165_v9, %v1105_v32  ;;  %v1293_v32 = vsub.s32 1, %v1269_v58  ;;  %v1456_v5 = vld [vmem:[#allocation4 + $0x8] sm:$0xff] }
 0x20c   :  { %v1170_v42 = vadd.f32 %v1166_v48, %v1106_v6 }
 0x20d   :  { %v1179_v18 = vpop.permute.xlu1 %1178 }
 0x211   :  { %v1177_v8 = vpop.permute.xlu0 %1176 }
 0x212   :  { %v1193_v45 = vpop.permute.xlu1 %1192  ;;  %v1181_v33 = vsel %vm1180_vm0, %v1175_v35, %v1177_v8  ;;  %v1182_v31 = vsel %vm1180_vm0, %v1177_v8, %v1179_v18 }
 0x213   :  { %v1197_v57 = vsel %vm1196_vm1, %v1191_v30, %v1193_v45  ;;  %v1185_v10 = vadd.f32 %v1181_v33, %v1169_v54  ;;  %v1186_v22 = vadd.f32 %v1182_v31, %v1170_v42 }
 0x215   :  { %v1195_v14 = vpop.permute.xlu0 %1194  ;;  %v1201_v52 = vadd.f32 %v1197_v57, %v1185_v10 }
 0x216   :  { %v1211_v39 = vpop.permute.xlu1 %1210  ;;  %v1198_v50 = vsel %vm1196_vm1, %v1193_v45, %v1195_v14 }
 0x217   :  { %v1202_v20 = vadd.f32 %v1198_v50, %v1186_v22 }
 0x21a   :  { %v1209_v62 = vpop.permute.xlu0 %1208 }
 0x21b   :  { %v1225_v4 = vpop.permute.xlu1 %1224  ;;  %v1213_v16 = vsel %vm1212_vm3, %v1207_v44, %v1209_v62  ;;  %v1214_v7 = vsel %vm1212_vm3, %v1209_v62, %v1211_v39 }
 0x21c   :  { %v1228_v41 = vsel %vm109_vm2, %v1223_v11, %v1225_v4  ;;  %v1217_v28 = vadd.f32 %v1213_v16, %v1201_v52  ;;  %v1218_v0 = vadd.f32 %v1214_v7, %v1202_v20  ;;  %v1455_v11 = vld [vmem:[#allocation4] sm:$0xff] }
 0x21e   :  { %v1227_v56 = vpop.permute.xlu0 %1226  ;;  %v1232_v17 = vadd.f32 %v1228_v41, %v1217_v28 }
 0x21f   :  { %v1229_v38 = vsel %vm109_vm2, %v1225_v4, %v1227_v56  ;;  %v1242_v36 = vpop.permute.xlu1 %1241 }
 0x220   :  { %v1233_v2 = vadd.f32 %v1229_v38, %v1218_v0 }
 0x223   :  { %v1240_v19 = vpop.permute.xlu0 %1239 }
 0x224   :  { %v1244_v46 = vsel %vm1243_vm4, %v1238_v47, %v1240_v19  ;;  %v1245_v51 = vsel %vm1243_vm4, %v1240_v19, %v1242_v36 }
 0x225   :  { %v1248_v27 = vadd.f32 %v1244_v46, %v1232_v17  ;;  %v1249_v3 = vadd.f32 %v1245_v51, %v1233_v2 }
 0x227   :  { %v1425_v29 = vmul.f32 -1.442695, %v1248_v27  ;;  %v1426_v24 = vmul.f32 -1.442695, %v1249_v3 }
 0x229   :  { %1447 = vpow2.f32 %v1425_v29 }
 0x22a   :  { %1449 = vpow2.f32 %v1426_v24 }
 0x233   :  { %v1448_v49 = vpop.eup %1447 }
 0x234   :  { %v1450_v34 = vpop.eup %1449  ;;  %v1256_v43 = vadd.f32 1.0, %v1448_v49 }
 0x235   :  { %v1257_v53 = vadd.f32 1.0, %v1450_v34 }
 0x236   :  { %1451 = vrcp.f32 %v1256_v43 }
 0x237   :  { %1453 = vrcp.f32 %v1257_v53 }
 0x240   :  { %v1452_v1 = vpop.eup %1451 }
 0x241   :  { %v1454_v55 = vpop.eup %1453 }
 0x242   :  { %v1264_v59 = vcombine.low %v1452_v1, %v1454_v55 }
 0x244   :  { %v1271_v23 = vrot.slane %v1264_v59, %v1270_v60 }
 0x246   :  { %v1272_v40 = vcombine.high %v1271_v23, %v1271_v23  ;;  %v1279_v21 = vrot.slane %v1271_v23, %v1270_v60 }
 0x248   :  { %v1286_v15 = vrot.slane %v1272_v40, %v1270_v60  ;;  %v1290_v6 = vrot.slane %v1279_v21, %v1289_v63  ;;  %v1294_v35 = vrot.slane %v1279_v21, %v1293_v32 }
 0x24a   :  { %v1298_v26 = vrot.slane %v1286_v15, %v1289_v63  ;;  %v1302_v44 = vrot.slane %v1286_v15, %v1293_v32  ;;  %v1303_v30 = vcombine.low %v1290_v6, %v1294_v35 }
 0x24c   :  { %v1304_v47 = vcombine.low %v1298_v26, %v1302_v44  ;;  %v1307_v12 = vmul.f32 %v1455_v11, %v1303_v30 }
 0x24e   :  { %v1308_v18 = vmul.f32 %v1456_v5, %v1304_v47  ;;  %1309 = vst [vmem:[#allocation7] sm:$0xff] %v1307_v12 }
 0x250   :  { %1310 = vst [vmem:[#allocation7 + $0x8] sm:$0xff] %v1308_v18 }
 0x251   :  { %1500 = shalt.err (!%p1497_p1)
}
 0x252   :  { %s3657_s29 = sld [smem:[#allocation168_spill]] }
 0x258   :  { %s1501_s20 = scalar_lea.hbm %s3657_s29, 256 }
 0x259   :  { %p1502_p2 = scmp.ne.s32.totalorder %s3657_s29, %s1501_s20  ;;  %p1505_p3 = scmp.lt.u32.totalorder %s1501_s20, %s3657_s29 }
 0x25b   :  { %p1507_p4 = pnand %p1505_p3, %p1502_p2 }
 0x25d   :  { %1510 = shalt.err (!%p1507_p4)
}
 0x25e   :  { %s3658_s18 = smov 8   ;;  %s3659_s19 = smov 128  }
 0x25f   :  { %1322 = dma.vmem_to_hbm [thread:$0]  %s1317_s3, 256, %s3657_s29, [#allocation6], %s3659_s19, %s3659_s19, %s3658_s18  }
 0x260   :  { %1515 = dma.done.wait [#allocation6], 256  }
 0x261   :  { %1516 = vsyncadd [#allocation6], 4294967040 }
 0x262   :  { %1326 = vsyncpa [#allocation5], 1 }
 0x263   :  { %1327 = vsyncpa [#allocation6], 1 }

</bundles_post_ra>
